<compile_context>
chip_gen: v5e
topology: v5e:2x2
jax: 0.10.0
libtpu: 0.0.40
codegen_flags: <defaults>
</compile_context>

<pallas_src>
import numpy as np
import jax
import jax.numpy as jnp
from jax.experimental import pallas as pl
from jax.experimental.pallas import tpu as pltpu


def _round_up(x, m):
    return ((x + m - 1) // m) * m


def _physical_vmem_bytes():
    """Per-core VMEM capacity; conservative v7x fallback (64 MiB)."""
    try:
        info = pltpu.get_tpu_info()
        for attr in ("vmem_capacity_bytes", "vmem_bytes", "vmem_size_bytes"):
            v = getattr(info, attr, None)
            if v:
                return int(v)
    except Exception:
        pass
    return 64 * 1024 * 1024


# ----------------------------------------------------------------------------
# Deterministic wavelet filter banks (Morlet-like, time-domain, circular).
# ----------------------------------------------------------------------------
def make_filter_bank(T, J, Q, high_freq=0.425):
    """Returns (psi_r, psi_i) of shape (S, T) with S = J*Q band-pass + 1 low-pass
    (low-pass is the last filter)."""
    t = np.arange(T)
    tt = ((t + T // 2) % T) - T // 2          # centered circular lag
    psis_r, psis_i = [], []
    for j in range(J * Q):
        xi = 2.0 * np.pi * high_freq / (2.0 ** (j / Q))
        sigma = 1.5 * (2.0 ** (j / Q))
        env = np.exp(-(tt ** 2) / (2.0 * sigma ** 2))
        env = env / env.sum()
        psis_r.append(env * np.cos(xi * tt))
        psis_i.append(env * np.sin(xi * tt))
    # low-pass (real Gaussian)
    sigma_phi = 1.5 * (2.0 ** J)
    phi = np.exp(-(tt ** 2) / (2.0 * sigma_phi ** 2))
    phi = phi / phi.sum()
    psis_r.append(phi)
    psis_i.append(np.zeros_like(phi))
    return (np.stack(psis_r).astype(np.float32),
            np.stack(psis_i).astype(np.float32))


def _circulant_blocks(psi_r, psi_i):
    """(S, T) filters -> per-scale circulant blocks (S, T, T) with
    C[s, tau, t] = psi[s, (t - tau) % T]  (rows = matmul contraction dim)."""
    T = psi_r.shape[1]
    idx = (np.arange(T)[None, :] - np.arange(T)[:, None]) % T
    return psi_r[:, idx], psi_i[:, idx]


def circulant_filter_matrix(psi_r, psi_i):
    """Full weight (T, 2*S*T): [real blocks (scale-major) | imag blocks]."""
    Cr, Ci = _circulant_blocks(psi_r, psi_i)
    S, T, _ = Cr.shape
    Wr = np.transpose(Cr, (1, 0, 2)).reshape(T, S * T)
    Wi = np.transpose(Ci, (1, 0, 2)).reshape(T, S * T)
    return np.concatenate([Wr, Wi], axis=1).astype(np.float32)


# ----------------------------------------------------------------------------
# Fused Pallas kernel: order-1 -> modulus -> order-2 -> moments -> pairwise cov
# ----------------------------------------------------------------------------
def _make_fused_kernel(T, S1, S1b, S2, paths, pairs, tm, out_cols, out_pad):
    low_scales = list(range(S1b, S1))

    def kernel(x_ref, w1_ref, w2_ref, out_ref):
        # ---- order-1 wavelet transform: one MXU matmul (bf16 in, f32 acc) ---
        out1 = jnp.dot(x_ref[...], w1_ref[...],
                       preferred_element_type=jnp.float32)         # (tm, 2*S1*T)
        zr = [out1[:, s * T:(s + 1) * T] for s in range(S1)]
        zi = [out1[:, (S1 + s) * T:(S1 + s + 1) * T] for s in range(S1)]
        mods = [jnp.sqrt(zr[s] * zr[s] + zi[s] * zi[s]) for s in range(S1b)]

        # ---- marginal moments: E{|Wx|} (band-pass), E{Wx} (low-pass) --------
        er = ([jnp.mean(mods[s], axis=-1, keepdims=True) for s in range(S1b)]
              + [jnp.mean(zr[s], axis=-1, keepdims=True) for s in low_scales])
        ei = ([jnp.zeros((tm, 1), jnp.float32) for _ in range(S1b)]
              + [jnp.mean(zi[s], axis=-1, keepdims=True) for s in low_scales])

        # ---- order-2 transform: all band-pass moduli in ONE MXU push --------
        z_r = list(zr)
        z_i = list(zi)
        if S1b > 0 and len(paths) > 0:
            m_stack = jnp.concatenate(mods, axis=0)                 # (S1b*tm, T)
            o2 = jnp.dot(m_stack.astype(jnp.bfloat16), w2_ref[...],
                         preferred_element_type=jnp.float32)        # (S1b*tm, 2*S2*T)
            for (j1, j2) in paths:                                  # admissible only
                z_r.append(o2[j1 * tm:(j1 + 1) * tm, j2 * T:(j2 + 1) * T])
                z_i.append(o2[j1 * tm:(j1 + 1) * tm,
                              (S2 + j2) * T:(S2 + j2 + 1) * T])

        # ---- phase-modulus correlation: only the admissible pairs (VPU/XLU) -
        # cov(l, r) = E_t{ z_l * conj(z_r) }
        cov_r, cov_i = [], []
        for (l, r) in pairs:
            cov_r.append(jnp.mean(z_r[l] * z_r[r] + z_i[l] * z_i[r],
                                  axis=-1, keepdims=True))
            cov_i.append(jnp.mean(z_i[l] * z_r[r] - z_r[l] * z_i[r],
                                  axis=-1, keepdims=True))

        # ---- single lane-dense output: [Er | Ei | Cov_r | Cov_i | pad] ------
        cols = er + ei + cov_r + cov_i
        if out_pad > out_cols:
            cols.append(jnp.zeros((tm, out_pad - out_cols), jnp.float32))
        out_ref[...] = jnp.concatenate(cols, axis=-1)               # (tm, out_pad)

    return kernel


def fused_scatcov(x_bf16, w1, w2, *, T, S1, S1b, S2, paths, pairs, tm,
                  out_cols, out_pad, vmem_limit_bytes):
    BN_pad = x_bf16.shape[0]
    grid = (BN_pad // tm,)
    kernel = _make_fused_kernel(T, S1, S1b, S2, paths, pairs, tm, out_cols, out_pad)
    return pl.pallas_call(
        kernel,
        out_shape=jax.ShapeDtypeStruct((BN_pad, out_pad), jnp.float32),
        grid=grid,
        in_specs=[pl.BlockSpec((tm, T), lambda i: (i, 0)),       # streamed rows
                  pl.BlockSpec(w1.shape, lambda i: (0, 0)),      # resident weight 1
                  pl.BlockSpec(w2.shape, lambda i: (0, 0))],     # resident weight 2
        out_specs=pl.BlockSpec((tm, out_pad), lambda i: (i, 0)),
        compiler_params=pltpu.CompilerParams(
            dimension_semantics=("parallel",),
            vmem_limit_bytes=vmem_limit_bytes),
    )(x_bf16, w1, w2)


# ----------------------------------------------------------------------------
# Model (model_type='cov', r=2, norm layer = Identity since sigma2 is None)
# ----------------------------------------------------------------------------
class ScatCovModel:
    def __init__(self, T, J=(3, 3), Q=(1, 1), high_freq=(0.425, 0.425)):
        self.T = T
        self.J1, self.Q1 = J[0], Q[0]
        self.J2, self.Q2 = J[1], Q[1]
        p1r, p1i = make_filter_bank(T, self.J1, self.Q1, high_freq[0])
        p2r, p2i = make_filter_bank(T, self.J2, self.Q2, high_freq[1])
        self.S1 = p1r.shape[0]                 # band-pass + low-pass
        self.S2 = p2r.shape[0]
        self.S1b = self.J1 * self.Q1           # band-pass only

        # admissible order-2 paths: j1 band-pass, j2 low-pass or j2 > j1
        self.adm = [[j2 for j2 in range(self.S2)
                     if (j2 == self.S2 - 1) or (j2 > j1)]
                    for j1 in range(self.S1b)]
        self.paths = [(j1, j2) for j1 in range(self.S1b) for j2 in self.adm[j1]]
        self.P2 = len(self.paths)
        self.K = self.S1 + self.P2

        # bf16 weights (MXU inputs); all accumulation stays f32 inside the kernel
        self.wmat1 = jnp.asarray(circulant_filter_matrix(p1r, p1i),
                                 dtype=jnp.bfloat16)                 # (T, 2*S1*T)
        self.wmat2 = jnp.asarray(circulant_filter_matrix(p2r, p2i),
                                 dtype=jnp.bfloat16)                 # (T, 2*S2*T)

        # covariance pair indices inside Z = [Wx (S1), W|Wx| (P2)]
        S1 = self.S1
        ww = [(l, r) for l in range(S1) for r in range(l, S1)]
        wmw = [(j2, S1 + p) for p, (j1, j2) in enumerate(self.paths)]
        mwmw = []
        for p, (j1, j2) in enumerate(self.paths):
            for pp, (j1p, j2p) in enumerate(self.paths):
                if j2p == j2 and pp >= p:
                    mwmw.append((S1 + p, S1 + pp))
        self.pairs = ww + wmw + mwmw
        self.n_cov = len(self.pairs)

    # rough upper bound on VMEM live bytes for a given row tile
    def _vmem_estimate(self, tm, out_pad):
        T, S1, S1b, S2, K = self.T, self.S1, self.S1b, self.S2, self.K
        w_bytes = 2 * 2 * (int(self.wmat1.size) + int(self.wmat2.size))  # bf16, x2 bufs
        x_tile = 2 * tm * T * 2                                     # dbl-buffered bf16
        out_tile = 2 * tm * out_pad * 4                             # dbl-buffered f32
        temps = (tm * 2 * S1 * T * 4                                # order-1 acts (f32)
                 + S1b * tm * T * (4 + 2)                           # moduli + bf16 LHS
                 + S1b * tm * 2 * S2 * T * 4                        # order-2 acts (f32)
                 + 2 * K * tm * T * 4)                              # live Z slices
        return int(w_bytes + x_tile + out_tile + 2 * temps)

    def forward(self, x):
        """x: (B, N, T) float32 -> y: (B, N*(S1 + n_cov), 1) complex64."""
        B, N, T = x.shape
        assert T == self.T
        BN = B * N
        S1, n_cov = self.S1, self.n_cov

        out_cols = 2 * S1 + 2 * n_cov
        out_pad = _round_up(out_cols, 128)          # lane-dense, unmasked stores

        # ---- generation-aware tile / VMEM-limit selection --------------------
        phys = _physical_vmem_bytes()
        tile_budget = phys * 3 // 4
        tm = 128
        while tm > 16 and self._vmem_estimate(tm, out_pad) > tile_budget:
            tm //= 2
        tm = max(16, min(tm, _round_up(max(BN, 1), 16)))   # bf16 sublane packing

        n_tiles = max(2, -(-BN // tm))              # >= 2 grid steps (v7x 2nd core)
        BN_pad = n_tiles * tm

        est = self._vmem_estimate(tm, out_pad)
        vmem_limit = max(32 * 1024 * 1024, min(phys * 4 // 5, 2 * est))

        # ---- stream rows (padding rows are zeros -> inert) -------------------
        x_flat = x.reshape(BN, T)
        if BN_pad != BN:
            x_flat = jnp.concatenate(
                [x_flat, jnp.zeros((BN_pad - BN, T), x_flat.dtype)], axis=0)
        x_bf16 = x_flat.astype(jnp.bfloat16)

        out = fused_scatcov(
            x_bf16, self.wmat1, self.wmat2,
            T=T, S1=S1, S1b=self.S1b, S2=self.S2,
            paths=self.paths, pairs=self.pairs, tm=tm,
            out_cols=out_cols, out_pad=out_pad, vmem_limit_bytes=vmem_limit)

        # ---- unpack the single lane-dense buffer -----------------------------
        er = out[:BN, :S1]
        ei = out[:BN, S1:2 * S1]
        cr = out[:BN, 2 * S1:2 * S1 + n_cov]
        ci = out[:BN, 2 * S1 + n_cov:2 * S1 + 2 * n_cov]

        exp_c = (er + 1j * ei).astype(jnp.complex64).reshape(B, N * S1, 1)
        cov_c = (cr + 1j * ci).astype(jnp.complex64).reshape(B, N * n_cov, 1)

        # ---- final output: cat([exp, cov], dim=1), complex --------------------
        return jnp.concatenate([exp_c, cov_c], axis=1)


# ----------------------------------------------------------------------------
if __name__ == "__main__":
    B, N, T = 2, 2, 64
    model = ScatCovModel(T=T, J=(3, 3), Q=(1, 1))

    key = jax.random.PRNGKey(0)
    x = jax.random.normal(key, (B, N, T), dtype=jnp.float32)

    y = model.forward(x)
    y = jax.block_until_ready(y)

    expected = (B, N * (model.S1 + model.n_cov), 1)
    assert y.shape == expected, (y.shape, expected)
    assert y.dtype == jnp.complex64
    assert bool(jnp.all(jnp.isfinite(y.real))) and bool(jnp.all(jnp.isfinite(y.imag)))
    print("KERNEL_OK")
</pallas_src>

<mosaic_0001>
module attributes {stable_mosaic.version = 11 : i64} {
  func.func @kernel(%arg0: i32, %arg1: memref<16x64xbf16, #tpu.memory_space<vmem>>, %arg2: memref<64x512xbf16, #tpu.memory_space<vmem>>, %arg3: memref<64x512xbf16, #tpu.memory_space<vmem>>, %arg4: memref<16x128xf32, #tpu.memory_space<vmem>>) attributes {dimension_semantics = [#tpu.dimension_semantics<parallel>], iteration_bounds = array<i64: 2>, scalar_prefetch = 0 : i64, scratch_operands = 0 : i64, tpu.core_type = #tpu.core_type<tc>, window_params = [{transform_indices = @transform_0, window_bounds = array<i64: 16, 64>}, {pipeline_mode = #tpu.pipeline_mode<synchronous>, transform_indices = @transform_1, window_bounds = array<i64: 64, 512>}, {pipeline_mode = #tpu.pipeline_mode<synchronous>, transform_indices = @transform_2, window_bounds = array<i64: 64, 512>}, {transform_indices = @transform_3, window_bounds = array<i64: 16, 128>}]} {
    %c0 = arith.constant 0 : index
    %c0_0 = arith.constant 0 : index
    %0 = vector.load %arg1[%c0, %c0_0] : memref<16x64xbf16, #tpu.memory_space<vmem>>, vector<16x64xbf16>
    %c0_1 = arith.constant 0 : index
    %c0_2 = arith.constant 0 : index
    %1 = vector.load %arg2[%c0_1, %c0_2] : memref<64x512xbf16, #tpu.memory_space<vmem>>, vector<64x512xbf16>
    %cst = arith.constant dense<0.000000e+00> : vector<16x512xf32>
    %2 = tpu.matmul %0, %1, %cst {dimension_numbers = #tpu.dot_dimension_numbers<[1], [0], [0], [1], [0, 0, 1, 1], [], []>} : vector<16x64xbf16>, vector<64x512xbf16>, vector<16x512xf32> -> vector<16x512xf32>
    %3 = vector.extract_strided_slice %2 {offsets = [0, 0], sizes = [16, 64], strides = [1, 1]} : vector<16x512xf32> to vector<16x64xf32>
    %4 = vector.extract_strided_slice %2 {offsets = [0, 64], sizes = [16, 64], strides = [1, 1]} : vector<16x512xf32> to vector<16x64xf32>
    %5 = vector.extract_strided_slice %2 {offsets = [0, 128], sizes = [16, 64], strides = [1, 1]} : vector<16x512xf32> to vector<16x64xf32>
    %6 = vector.extract_strided_slice %2 {offsets = [0, 192], sizes = [16, 64], strides = [1, 1]} : vector<16x512xf32> to vector<16x64xf32>
    %7 = vector.extract_strided_slice %2 {offsets = [0, 256], sizes = [16, 64], strides = [1, 1]} : vector<16x512xf32> to vector<16x64xf32>
    %8 = vector.extract_strided_slice %2 {offsets = [0, 320], sizes = [16, 64], strides = [1, 1]} : vector<16x512xf32> to vector<16x64xf32>
    %9 = vector.extract_strided_slice %2 {offsets = [0, 384], sizes = [16, 64], strides = [1, 1]} : vector<16x512xf32> to vector<16x64xf32>
    %10 = vector.extract_strided_slice %2 {offsets = [0, 448], sizes = [16, 64], strides = [1, 1]} : vector<16x512xf32> to vector<16x64xf32>
    %11 = arith.mulf %3, %3 : vector<16x64xf32>
    %12 = arith.mulf %7, %7 : vector<16x64xf32>
    %13 = arith.addf %11, %12 : vector<16x64xf32>
    %14 = math.sqrt %13 : vector<16x64xf32>
    %15 = arith.mulf %4, %4 : vector<16x64xf32>
    %16 = arith.mulf %8, %8 : vector<16x64xf32>
    %17 = arith.addf %15, %16 : vector<16x64xf32>
    %18 = math.sqrt %17 : vector<16x64xf32>
    %19 = arith.mulf %5, %5 : vector<16x64xf32>
    %20 = arith.mulf %9, %9 : vector<16x64xf32>
    %21 = arith.addf %19, %20 : vector<16x64xf32>
    %22 = math.sqrt %21 : vector<16x64xf32>
    %cst_3 = arith.constant dense<0.000000e+00> : vector<16xf32>
    %23 = vector.multi_reduction <add>, %14, %cst_3 [1] : vector<16x64xf32> to vector<16xf32>
    %24 = vector.shape_cast %23 : vector<16xf32> to vector<16x1xf32>
    %cst_4 = arith.constant 6.400000e+01 : f32
    %25 = vector.broadcast %cst_4 : f32 to vector<16x1xf32>
    %26 = arith.divf %24, %25 : vector<16x1xf32>
    %cst_5 = arith.constant dense<0.000000e+00> : vector<16xf32>
    %27 = vector.multi_reduction <add>, %18, %cst_5 [1] : vector<16x64xf32> to vector<16xf32>
    %28 = vector.shape_cast %27 : vector<16xf32> to vector<16x1xf32>
    %cst_6 = arith.constant 6.400000e+01 : f32
    %29 = vector.broadcast %cst_6 : f32 to vector<16x1xf32>
    %30 = arith.divf %28, %29 : vector<16x1xf32>
    %cst_7 = arith.constant dense<0.000000e+00> : vector<16xf32>
    %31 = vector.multi_reduction <add>, %22, %cst_7 [1] : vector<16x64xf32> to vector<16xf32>
    %32 = vector.shape_cast %31 : vector<16xf32> to vector<16x1xf32>
    %cst_8 = arith.constant 6.400000e+01 : f32
    %33 = vector.broadcast %cst_8 : f32 to vector<16x1xf32>
    %34 = arith.divf %32, %33 : vector<16x1xf32>
    %cst_9 = arith.constant dense<0.000000e+00> : vector<16xf32>
    %35 = vector.multi_reduction <add>, %6, %cst_9 [1] : vector<16x64xf32> to vector<16xf32>
    %36 = vector.shape_cast %35 : vector<16xf32> to vector<16x1xf32>
    %cst_10 = arith.constant 6.400000e+01 : f32
    %37 = vector.broadcast %cst_10 : f32 to vector<16x1xf32>
    %38 = arith.divf %36, %37 : vector<16x1xf32>
    %cst_11 = arith.constant 0.000000e+00 : f32
    %39 = vector.broadcast %cst_11 : f32 to vector<16x1xf32>
    %cst_12 = arith.constant 0.000000e+00 : f32
    %40 = vector.broadcast %cst_12 : f32 to vector<16x1xf32>
    %cst_13 = arith.constant 0.000000e+00 : f32
    %41 = vector.broadcast %cst_13 : f32 to vector<16x1xf32>
    %cst_14 = arith.constant dense<0.000000e+00> : vector<16xf32>
    %42 = vector.multi_reduction <add>, %10, %cst_14 [1] : vector<16x64xf32> to vector<16xf32>
    %43 = vector.shape_cast %42 : vector<16xf32> to vector<16x1xf32>
    %cst_15 = arith.constant 6.400000e+01 : f32
    %44 = vector.broadcast %cst_15 : f32 to vector<16x1xf32>
    %45 = arith.divf %43, %44 : vector<16x1xf32>
    %46 = tpu.concatenate %14, %18, %22 in 0 : vector<16x64xf32>, vector<16x64xf32>, vector<16x64xf32> -> vector<48x64xf32>
    %47 = arith.truncf %46 : vector<48x64xf32> to vector<48x64xbf16>
    %c0_16 = arith.constant 0 : index
    %c0_17 = arith.constant 0 : index
    %48 = vector.load %arg3[%c0_16, %c0_17] : memref<64x512xbf16, #tpu.memory_space<vmem>>, vector<64x512xbf16>
    %cst_18 = arith.constant dense<0.000000e+00> : vector<48x512xf32>
    %49 = tpu.matmul %47, %48, %cst_18 {dimension_numbers = #tpu.dot_dimension_numbers<[1], [0], [0], [1], [0, 0, 1, 1], [], []>} : vector<48x64xbf16>, vector<64x512xbf16>, vector<48x512xf32> -> vector<48x512xf32>
    %50 = vector.extract_strided_slice %49 {offsets = [0, 64], sizes = [16, 64], strides = [1, 1]} : vector<48x512xf32> to vector<16x64xf32>
    %51 = vector.extract_strided_slice %49 {offsets = [0, 320], sizes = [16, 64], strides = [1, 1]} : vector<48x512xf32> to vector<16x64xf32>
    %52 = vector.extract_strided_slice %49 {offsets = [0, 128], sizes = [16, 64], strides = [1, 1]} : vector<48x512xf32> to vector<16x64xf32>
    %53 = vector.extract_strided_slice %49 {offsets = [0, 384], sizes = [16, 64], strides = [1, 1]} : vector<48x512xf32> to vector<16x64xf32>
    %54 = vector.extract_strided_slice %49 {offsets = [0, 192], sizes = [16, 64], strides = [1, 1]} : vector<48x512xf32> to vector<16x64xf32>
    %55 = vector.extract_strided_slice %49 {offsets = [0, 448], sizes = [16, 64], strides = [1, 1]} : vector<48x512xf32> to vector<16x64xf32>
    %56 = vector.extract_strided_slice %49 {offsets = [16, 128], sizes = [16, 64], strides = [1, 1]} : vector<48x512xf32> to vector<16x64xf32>
    %57 = vector.extract_strided_slice %49 {offsets = [16, 384], sizes = [16, 64], strides = [1, 1]} : vector<48x512xf32> to vector<16x64xf32>
    %58 = vector.extract_strided_slice %49 {offsets = [16, 192], sizes = [16, 64], strides = [1, 1]} : vector<48x512xf32> to vector<16x64xf32>
    %59 = vector.extract_strided_slice %49 {offsets = [16, 448], sizes = [16, 64], strides = [1, 1]} : vector<48x512xf32> to vector<16x64xf32>
    %60 = vector.extract_strided_slice %49 {offsets = [32, 192], sizes = [16, 64], strides = [1, 1]} : vector<48x512xf32> to vector<16x64xf32>
    %61 = vector.extract_strided_slice %49 {offsets = [32, 448], sizes = [16, 64], strides = [1, 1]} : vector<48x512xf32> to vector<16x64xf32>
    %62 = arith.mulf %3, %3 : vector<16x64xf32>
    %63 = arith.mulf %7, %7 : vector<16x64xf32>
    %64 = arith.addf %62, %63 : vector<16x64xf32>
    %cst_19 = arith.constant dense<0.000000e+00> : vector<16xf32>
    %65 = vector.multi_reduction <add>, %64, %cst_19 [1] : vector<16x64xf32> to vector<16xf32>
    %66 = vector.shape_cast %65 : vector<16xf32> to vector<16x1xf32>
    %cst_20 = arith.constant 6.400000e+01 : f32
    %67 = vector.broadcast %cst_20 : f32 to vector<16x1xf32>
    %68 = arith.divf %66, %67 : vector<16x1xf32>
    %69 = arith.mulf %7, %3 : vector<16x64xf32>
    %70 = arith.mulf %3, %7 : vector<16x64xf32>
    %71 = arith.subf %69, %70 : vector<16x64xf32>
    %cst_21 = arith.constant dense<0.000000e+00> : vector<16xf32>
    %72 = vector.multi_reduction <add>, %71, %cst_21 [1] : vector<16x64xf32> to vector<16xf32>
    %73 = vector.shape_cast %72 : vector<16xf32> to vector<16x1xf32>
    %cst_22 = arith.constant 6.400000e+01 : f32
    %74 = vector.broadcast %cst_22 : f32 to vector<16x1xf32>
    %75 = arith.divf %73, %74 : vector<16x1xf32>
    %76 = arith.mulf %3, %4 : vector<16x64xf32>
    %77 = arith.mulf %7, %8 : vector<16x64xf32>
    %78 = arith.addf %76, %77 : vector<16x64xf32>
    %cst_23 = arith.constant dense<0.000000e+00> : vector<16xf32>
    %79 = vector.multi_reduction <add>, %78, %cst_23 [1] : vector<16x64xf32> to vector<16xf32>
    %80 = vector.shape_cast %79 : vector<16xf32> to vector<16x1xf32>
    %cst_24 = arith.constant 6.400000e+01 : f32
    %81 = vector.broadcast %cst_24 : f32 to vector<16x1xf32>
    %82 = arith.divf %80, %81 : vector<16x1xf32>
    %83 = arith.mulf %7, %4 : vector<16x64xf32>
    %84 = arith.mulf %3, %8 : vector<16x64xf32>
    %85 = arith.subf %83, %84 : vector<16x64xf32>
    %cst_25 = arith.constant dense<0.000000e+00> : vector<16xf32>
    %86 = vector.multi_reduction <add>, %85, %cst_25 [1] : vector<16x64xf32> to vector<16xf32>
    %87 = vector.shape_cast %86 : vector<16xf32> to vector<16x1xf32>
    %cst_26 = arith.constant 6.400000e+01 : f32
    %88 = vector.broadcast %cst_26 : f32 to vector<16x1xf32>
    %89 = arith.divf %87, %88 : vector<16x1xf32>
    %90 = arith.mulf %3, %5 : vector<16x64xf32>
    %91 = arith.mulf %7, %9 : vector<16x64xf32>
    %92 = arith.addf %90, %91 : vector<16x64xf32>
    %cst_27 = arith.constant dense<0.000000e+00> : vector<16xf32>
    %93 = vector.multi_reduction <add>, %92, %cst_27 [1] : vector<16x64xf32> to vector<16xf32>
    %94 = vector.shape_cast %93 : vector<16xf32> to vector<16x1xf32>
    %cst_28 = arith.constant 6.400000e+01 : f32
    %95 = vector.broadcast %cst_28 : f32 to vector<16x1xf32>
    %96 = arith.divf %94, %95 : vector<16x1xf32>
    %97 = arith.mulf %7, %5 : vector<16x64xf32>
    %98 = arith.mulf %3, %9 : vector<16x64xf32>
    %99 = arith.subf %97, %98 : vector<16x64xf32>
    %cst_29 = arith.constant dense<0.000000e+00> : vector<16xf32>
    %100 = vector.multi_reduction <add>, %99, %cst_29 [1] : vector<16x64xf32> to vector<16xf32>
    %101 = vector.shape_cast %100 : vector<16xf32> to vector<16x1xf32>
    %cst_30 = arith.constant 6.400000e+01 : f32
    %102 = vector.broadcast %cst_30 : f32 to vector<16x1xf32>
    %103 = arith.divf %101, %102 : vector<16x1xf32>
    %104 = arith.mulf %3, %6 : vector<16x64xf32>
    %105 = arith.mulf %7, %10 : vector<16x64xf32>
    %106 = arith.addf %104, %105 : vector<16x64xf32>
    %cst_31 = arith.constant dense<0.000000e+00> : vector<16xf32>
    %107 = vector.multi_reduction <add>, %106, %cst_31 [1] : vector<16x64xf32> to vector<16xf32>
    %108 = vector.shape_cast %107 : vector<16xf32> to vector<16x1xf32>
    %cst_32 = arith.constant 6.400000e+01 : f32
    %109 = vector.broadcast %cst_32 : f32 to vector<16x1xf32>
    %110 = arith.divf %108, %109 : vector<16x1xf32>
    %111 = arith.mulf %7, %6 : vector<16x64xf32>
    %112 = arith.mulf %3, %10 : vector<16x64xf32>
    %113 = arith.subf %111, %112 : vector<16x64xf32>
    %cst_33 = arith.constant dense<0.000000e+00> : vector<16xf32>
    %114 = vector.multi_reduction <add>, %113, %cst_33 [1] : vector<16x64xf32> to vector<16xf32>
    %115 = vector.shape_cast %114 : vector<16xf32> to vector<16x1xf32>
    %cst_34 = arith.constant 6.400000e+01 : f32
    %116 = vector.broadcast %cst_34 : f32 to vector<16x1xf32>
    %117 = arith.divf %115, %116 : vector<16x1xf32>
    %118 = arith.mulf %4, %4 : vector<16x64xf32>
    %119 = arith.mulf %8, %8 : vector<16x64xf32>
    %120 = arith.addf %118, %119 : vector<16x64xf32>
    %cst_35 = arith.constant dense<0.000000e+00> : vector<16xf32>
    %121 = vector.multi_reduction <add>, %120, %cst_35 [1] : vector<16x64xf32> to vector<16xf32>
    %122 = vector.shape_cast %121 : vector<16xf32> to vector<16x1xf32>
    %cst_36 = arith.constant 6.400000e+01 : f32
    %123 = vector.broadcast %cst_36 : f32 to vector<16x1xf32>
    %124 = arith.divf %122, %123 : vector<16x1xf32>
    %125 = arith.mulf %8, %4 : vector<16x64xf32>
    %126 = arith.mulf %4, %8 : vector<16x64xf32>
    %127 = arith.subf %125, %126 : vector<16x64xf32>
    %cst_37 = arith.constant dense<0.000000e+00> : vector<16xf32>
    %128 = vector.multi_reduction <add>, %127, %cst_37 [1] : vector<16x64xf32> to vector<16xf32>
    %129 = vector.shape_cast %128 : vector<16xf32> to vector<16x1xf32>
    %cst_38 = arith.constant 6.400000e+01 : f32
    %130 = vector.broadcast %cst_38 : f32 to vector<16x1xf32>
    %131 = arith.divf %129, %130 : vector<16x1xf32>
    %132 = arith.mulf %4, %5 : vector<16x64xf32>
    %133 = arith.mulf %8, %9 : vector<16x64xf32>
    %134 = arith.addf %132, %133 : vector<16x64xf32>
    %cst_39 = arith.constant dense<0.000000e+00> : vector<16xf32>
    %135 = vector.multi_reduction <add>, %134, %cst_39 [1] : vector<16x64xf32> to vector<16xf32>
    %136 = vector.shape_cast %135 : vector<16xf32> to vector<16x1xf32>
    %cst_40 = arith.constant 6.400000e+01 : f32
    %137 = vector.broadcast %cst_40 : f32 to vector<16x1xf32>
    %138 = arith.divf %136, %137 : vector<16x1xf32>
    %139 = arith.mulf %8, %5 : vector<16x64xf32>
    %140 = arith.mulf %4, %9 : vector<16x64xf32>
    %141 = arith.subf %139, %140 : vector<16x64xf32>
    %cst_41 = arith.constant dense<0.000000e+00> : vector<16xf32>
    %142 = vector.multi_reduction <add>, %141, %cst_41 [1] : vector<16x64xf32> to vector<16xf32>
    %143 = vector.shape_cast %142 : vector<16xf32> to vector<16x1xf32>
    %cst_42 = arith.constant 6.400000e+01 : f32
    %144 = vector.broadcast %cst_42 : f32 to vector<16x1xf32>
    %145 = arith.divf %143, %144 : vector<16x1xf32>
    %146 = arith.mulf %4, %6 : vector<16x64xf32>
    %147 = arith.mulf %8, %10 : vector<16x64xf32>
    %148 = arith.addf %146, %147 : vector<16x64xf32>
    %cst_43 = arith.constant dense<0.000000e+00> : vector<16xf32>
    %149 = vector.multi_reduction <add>, %148, %cst_43 [1] : vector<16x64xf32> to vector<16xf32>
    %150 = vector.shape_cast %149 : vector<16xf32> to vector<16x1xf32>
    %cst_44 = arith.constant 6.400000e+01 : f32
    %151 = vector.broadcast %cst_44 : f32 to vector<16x1xf32>
    %152 = arith.divf %150, %151 : vector<16x1xf32>
    %153 = arith.mulf %8, %6 : vector<16x64xf32>
    %154 = arith.mulf %4, %10 : vector<16x64xf32>
    %155 = arith.subf %153, %154 : vector<16x64xf32>
    %cst_45 = arith.constant dense<0.000000e+00> : vector<16xf32>
    %156 = vector.multi_reduction <add>, %155, %cst_45 [1] : vector<16x64xf32> to vector<16xf32>
    %157 = vector.shape_cast %156 : vector<16xf32> to vector<16x1xf32>
    %cst_46 = arith.constant 6.400000e+01 : f32
    %158 = vector.broadcast %cst_46 : f32 to vector<16x1xf32>
    %159 = arith.divf %157, %158 : vector<16x1xf32>
    %160 = arith.mulf %5, %5 : vector<16x64xf32>
    %161 = arith.mulf %9, %9 : vector<16x64xf32>
    %162 = arith.addf %160, %161 : vector<16x64xf32>
    %cst_47 = arith.constant dense<0.000000e+00> : vector<16xf32>
    %163 = vector.multi_reduction <add>, %162, %cst_47 [1] : vector<16x64xf32> to vector<16xf32>
    %164 = vector.shape_cast %163 : vector<16xf32> to vector<16x1xf32>
    %cst_48 = arith.constant 6.400000e+01 : f32
    %165 = vector.broadcast %cst_48 : f32 to vector<16x1xf32>
    %166 = arith.divf %164, %165 : vector<16x1xf32>
    %167 = arith.mulf %9, %5 : vector<16x64xf32>
    %168 = arith.mulf %5, %9 : vector<16x64xf32>
    %169 = arith.subf %167, %168 : vector<16x64xf32>
    %cst_49 = arith.constant dense<0.000000e+00> : vector<16xf32>
    %170 = vector.multi_reduction <add>, %169, %cst_49 [1] : vector<16x64xf32> to vector<16xf32>
    %171 = vector.shape_cast %170 : vector<16xf32> to vector<16x1xf32>
    %cst_50 = arith.constant 6.400000e+01 : f32
    %172 = vector.broadcast %cst_50 : f32 to vector<16x1xf32>
    %173 = arith.divf %171, %172 : vector<16x1xf32>
    %174 = arith.mulf %5, %6 : vector<16x64xf32>
    %175 = arith.mulf %9, %10 : vector<16x64xf32>
    %176 = arith.addf %174, %175 : vector<16x64xf32>
    %cst_51 = arith.constant dense<0.000000e+00> : vector<16xf32>
    %177 = vector.multi_reduction <add>, %176, %cst_51 [1] : vector<16x64xf32> to vector<16xf32>
    %178 = vector.shape_cast %177 : vector<16xf32> to vector<16x1xf32>
    %cst_52 = arith.constant 6.400000e+01 : f32
    %179 = vector.broadcast %cst_52 : f32 to vector<16x1xf32>
    %180 = arith.divf %178, %179 : vector<16x1xf32>
    %181 = arith.mulf %9, %6 : vector<16x64xf32>
    %182 = arith.mulf %5, %10 : vector<16x64xf32>
    %183 = arith.subf %181, %182 : vector<16x64xf32>
    %cst_53 = arith.constant dense<0.000000e+00> : vector<16xf32>
    %184 = vector.multi_reduction <add>, %183, %cst_53 [1] : vector<16x64xf32> to vector<16xf32>
    %185 = vector.shape_cast %184 : vector<16xf32> to vector<16x1xf32>
    %cst_54 = arith.constant 6.400000e+01 : f32
    %186 = vector.broadcast %cst_54 : f32 to vector<16x1xf32>
    %187 = arith.divf %185, %186 : vector<16x1xf32>
    %188 = arith.mulf %6, %6 : vector<16x64xf32>
    %189 = arith.mulf %10, %10 : vector<16x64xf32>
    %190 = arith.addf %188, %189 : vector<16x64xf32>
    %cst_55 = arith.constant dense<0.000000e+00> : vector<16xf32>
    %191 = vector.multi_reduction <add>, %190, %cst_55 [1] : vector<16x64xf32> to vector<16xf32>
    %192 = vector.shape_cast %191 : vector<16xf32> to vector<16x1xf32>
    %cst_56 = arith.constant 6.400000e+01 : f32
    %193 = vector.broadcast %cst_56 : f32 to vector<16x1xf32>
    %194 = arith.divf %192, %193 : vector<16x1xf32>
    %195 = arith.mulf %10, %6 : vector<16x64xf32>
    %196 = arith.mulf %6, %10 : vector<16x64xf32>
    %197 = arith.subf %195, %196 : vector<16x64xf32>
    %cst_57 = arith.constant dense<0.000000e+00> : vector<16xf32>
    %198 = vector.multi_reduction <add>, %197, %cst_57 [1] : vector<16x64xf32> to vector<16xf32>
    %199 = vector.shape_cast %198 : vector<16xf32> to vector<16x1xf32>
    %cst_58 = arith.constant 6.400000e+01 : f32
    %200 = vector.broadcast %cst_58 : f32 to vector<16x1xf32>
    %201 = arith.divf %199, %200 : vector<16x1xf32>
    %202 = arith.mulf %4, %50 : vector<16x64xf32>
    %203 = arith.mulf %8, %51 : vector<16x64xf32>
    %204 = arith.addf %202, %203 : vector<16x64xf32>
    %cst_59 = arith.constant dense<0.000000e+00> : vector<16xf32>
    %205 = vector.multi_reduction <add>, %204, %cst_59 [1] : vector<16x64xf32> to vector<16xf32>
    %206 = vector.shape_cast %205 : vector<16xf32> to vector<16x1xf32>
    %cst_60 = arith.constant 6.400000e+01 : f32
    %207 = vector.broadcast %cst_60 : f32 to vector<16x1xf32>
    %208 = arith.divf %206, %207 : vector<16x1xf32>
    %209 = arith.mulf %8, %50 : vector<16x64xf32>
    %210 = arith.mulf %4, %51 : vector<16x64xf32>
    %211 = arith.subf %209, %210 : vector<16x64xf32>
    %cst_61 = arith.constant dense<0.000000e+00> : vector<16xf32>
    %212 = vector.multi_reduction <add>, %211, %cst_61 [1] : vector<16x64xf32> to vector<16xf32>
    %213 = vector.shape_cast %212 : vector<16xf32> to vector<16x1xf32>
    %cst_62 = arith.constant 6.400000e+01 : f32
    %214 = vector.broadcast %cst_62 : f32 to vector<16x1xf32>
    %215 = arith.divf %213, %214 : vector<16x1xf32>
    %216 = arith.mulf %5, %52 : vector<16x64xf32>
    %217 = arith.mulf %9, %53 : vector<16x64xf32>
    %218 = arith.addf %216, %217 : vector<16x64xf32>
    %cst_63 = arith.constant dense<0.000000e+00> : vector<16xf32>
    %219 = vector.multi_reduction <add>, %218, %cst_63 [1] : vector<16x64xf32> to vector<16xf32>
    %220 = vector.shape_cast %219 : vector<16xf32> to vector<16x1xf32>
    %cst_64 = arith.constant 6.400000e+01 : f32
    %221 = vector.broadcast %cst_64 : f32 to vector<16x1xf32>
    %222 = arith.divf %220, %221 : vector<16x1xf32>
    %223 = arith.mulf %9, %52 : vector<16x64xf32>
    %224 = arith.mulf %5, %53 : vector<16x64xf32>
    %225 = arith.subf %223, %224 : vector<16x64xf32>
    %cst_65 = arith.constant dense<0.000000e+00> : vector<16xf32>
    %226 = vector.multi_reduction <add>, %225, %cst_65 [1] : vector<16x64xf32> to vector<16xf32>
    %227 = vector.shape_cast %226 : vector<16xf32> to vector<16x1xf32>
    %cst_66 = arith.constant 6.400000e+01 : f32
    %228 = vector.broadcast %cst_66 : f32 to vector<16x1xf32>
    %229 = arith.divf %227, %228 : vector<16x1xf32>
    %230 = arith.mulf %6, %54 : vector<16x64xf32>
    %231 = arith.mulf %10, %55 : vector<16x64xf32>
    %232 = arith.addf %230, %231 : vector<16x64xf32>
    %cst_67 = arith.constant dense<0.000000e+00> : vector<16xf32>
    %233 = vector.multi_reduction <add>, %232, %cst_67 [1] : vector<16x64xf32> to vector<16xf32>
    %234 = vector.shape_cast %233 : vector<16xf32> to vector<16x1xf32>
    %cst_68 = arith.constant 6.400000e+01 : f32
    %235 = vector.broadcast %cst_68 : f32 to vector<16x1xf32>
    %236 = arith.divf %234, %235 : vector<16x1xf32>
    %237 = arith.mulf %10, %54 : vector<16x64xf32>
    %238 = arith.mulf %6, %55 : vector<16x64xf32>
    %239 = arith.subf %237, %238 : vector<16x64xf32>
    %cst_69 = arith.constant dense<0.000000e+00> : vector<16xf32>
    %240 = vector.multi_reduction <add>, %239, %cst_69 [1] : vector<16x64xf32> to vector<16xf32>
    %241 = vector.shape_cast %240 : vector<16xf32> to vector<16x1xf32>
    %cst_70 = arith.constant 6.400000e+01 : f32
    %242 = vector.broadcast %cst_70 : f32 to vector<16x1xf32>
    %243 = arith.divf %241, %242 : vector<16x1xf32>
    %244 = arith.mulf %5, %56 : vector<16x64xf32>
    %245 = arith.mulf %9, %57 : vector<16x64xf32>
    %246 = arith.addf %244, %245 : vector<16x64xf32>
    %cst_71 = arith.constant dense<0.000000e+00> : vector<16xf32>
    %247 = vector.multi_reduction <add>, %246, %cst_71 [1] : vector<16x64xf32> to vector<16xf32>
    %248 = vector.shape_cast %247 : vector<16xf32> to vector<16x1xf32>
    %cst_72 = arith.constant 6.400000e+01 : f32
    %249 = vector.broadcast %cst_72 : f32 to vector<16x1xf32>
    %250 = arith.divf %248, %249 : vector<16x1xf32>
    %251 = arith.mulf %9, %56 : vector<16x64xf32>
    %252 = arith.mulf %5, %57 : vector<16x64xf32>
    %253 = arith.subf %251, %252 : vector<16x64xf32>
    %cst_73 = arith.constant dense<0.000000e+00> : vector<16xf32>
    %254 = vector.multi_reduction <add>, %253, %cst_73 [1] : vector<16x64xf32> to vector<16xf32>
    %255 = vector.shape_cast %254 : vector<16xf32> to vector<16x1xf32>
    %cst_74 = arith.constant 6.400000e+01 : f32
    %256 = vector.broadcast %cst_74 : f32 to vector<16x1xf32>
    %257 = arith.divf %255, %256 : vector<16x1xf32>
    %258 = arith.mulf %6, %58 : vector<16x64xf32>
    %259 = arith.mulf %10, %59 : vector<16x64xf32>
    %260 = arith.addf %258, %259 : vector<16x64xf32>
    %cst_75 = arith.constant dense<0.000000e+00> : vector<16xf32>
    %261 = vector.multi_reduction <add>, %260, %cst_75 [1] : vector<16x64xf32> to vector<16xf32>
    %262 = vector.shape_cast %261 : vector<16xf32> to vector<16x1xf32>
    %cst_76 = arith.constant 6.400000e+01 : f32
    %263 = vector.broadcast %cst_76 : f32 to vector<16x1xf32>
    %264 = arith.divf %262, %263 : vector<16x1xf32>
    %265 = arith.mulf %10, %58 : vector<16x64xf32>
    %266 = arith.mulf %6, %59 : vector<16x64xf32>
    %267 = arith.subf %265, %266 : vector<16x64xf32>
    %cst_77 = arith.constant dense<0.000000e+00> : vector<16xf32>
    %268 = vector.multi_reduction <add>, %267, %cst_77 [1] : vector<16x64xf32> to vector<16xf32>
    %269 = vector.shape_cast %268 : vector<16xf32> to vector<16x1xf32>
    %cst_78 = arith.constant 6.400000e+01 : f32
    %270 = vector.broadcast %cst_78 : f32 to vector<16x1xf32>
    %271 = arith.divf %269, %270 : vector<16x1xf32>
    %272 = arith.mulf %6, %60 : vector<16x64xf32>
    %273 = arith.mulf %10, %61 : vector<16x64xf32>
    %274 = arith.addf %272, %273 : vector<16x64xf32>
    %cst_79 = arith.constant dense<0.000000e+00> : vector<16xf32>
    %275 = vector.multi_reduction <add>, %274, %cst_79 [1] : vector<16x64xf32> to vector<16xf32>
    %276 = vector.shape_cast %275 : vector<16xf32> to vector<16x1xf32>
    %cst_80 = arith.constant 6.400000e+01 : f32
    %277 = vector.broadcast %cst_80 : f32 to vector<16x1xf32>
    %278 = arith.divf %276, %277 : vector<16x1xf32>
    %279 = arith.mulf %10, %60 : vector<16x64xf32>
    %280 = arith.mulf %6, %61 : vector<16x64xf32>
    %281 = arith.subf %279, %280 : vector<16x64xf32>
    %cst_81 = arith.constant dense<0.000000e+00> : vector<16xf32>
    %282 = vector.multi_reduction <add>, %281, %cst_81 [1] : vector<16x64xf32> to vector<16xf32>
    %283 = vector.shape_cast %282 : vector<16xf32> to vector<16x1xf32>
    %cst_82 = arith.constant 6.400000e+01 : f32
    %284 = vector.broadcast %cst_82 : f32 to vector<16x1xf32>
    %285 = arith.divf %283, %284 : vector<16x1xf32>
    %286 = arith.mulf %50, %50 : vector<16x64xf32>
    %287 = arith.mulf %51, %51 : vector<16x64xf32>
    %288 = arith.addf %286, %287 : vector<16x64xf32>
    %cst_83 = arith.constant dense<0.000000e+00> : vector<16xf32>
    %289 = vector.multi_reduction <add>, %288, %cst_83 [1] : vector<16x64xf32> to vector<16xf32>
    %290 = vector.shape_cast %289 : vector<16xf32> to vector<16x1xf32>
    %cst_84 = arith.constant 6.400000e+01 : f32
    %291 = vector.broadcast %cst_84 : f32 to vector<16x1xf32>
    %292 = arith.divf %290, %291 : vector<16x1xf32>
    %293 = arith.mulf %51, %50 : vector<16x64xf32>
    %294 = arith.mulf %50, %51 : vector<16x64xf32>
    %295 = arith.subf %293, %294 : vector<16x64xf32>
    %cst_85 = arith.constant dense<0.000000e+00> : vector<16xf32>
    %296 = vector.multi_reduction <add>, %295, %cst_85 [1] : vector<16x64xf32> to vector<16xf32>
    %297 = vector.shape_cast %296 : vector<16xf32> to vector<16x1xf32>
    %cst_86 = arith.constant 6.400000e+01 : f32
    %298 = vector.broadcast %cst_86 : f32 to vector<16x1xf32>
    %299 = arith.divf %297, %298 : vector<16x1xf32>
    %300 = arith.mulf %52, %52 : vector<16x64xf32>
    %301 = arith.mulf %53, %53 : vector<16x64xf32>
    %302 = arith.addf %300, %301 : vector<16x64xf32>
    %cst_87 = arith.constant dense<0.000000e+00> : vector<16xf32>
    %303 = vector.multi_reduction <add>, %302, %cst_87 [1] : vector<16x64xf32> to vector<16xf32>
    %304 = vector.shape_cast %303 : vector<16xf32> to vector<16x1xf32>
    %cst_88 = arith.constant 6.400000e+01 : f32
    %305 = vector.broadcast %cst_88 : f32 to vector<16x1xf32>
    %306 = arith.divf %304, %305 : vector<16x1xf32>
    %307 = arith.mulf %53, %52 : vector<16x64xf32>
    %308 = arith.mulf %52, %53 : vector<16x64xf32>
    %309 = arith.subf %307, %308 : vector<16x64xf32>
    %cst_89 = arith.constant dense<0.000000e+00> : vector<16xf32>
    %310 = vector.multi_reduction <add>, %309, %cst_89 [1] : vector<16x64xf32> to vector<16xf32>
    %311 = vector.shape_cast %310 : vector<16xf32> to vector<16x1xf32>
    %cst_90 = arith.constant 6.400000e+01 : f32
    %312 = vector.broadcast %cst_90 : f32 to vector<16x1xf32>
    %313 = arith.divf %311, %312 : vector<16x1xf32>
    %314 = arith.mulf %52, %56 : vector<16x64xf32>
    %315 = arith.mulf %53, %57 : vector<16x64xf32>
    %316 = arith.addf %314, %315 : vector<16x64xf32>
    %cst_91 = arith.constant dense<0.000000e+00> : vector<16xf32>
    %317 = vector.multi_reduction <add>, %316, %cst_91 [1] : vector<16x64xf32> to vector<16xf32>
    %318 = vector.shape_cast %317 : vector<16xf32> to vector<16x1xf32>
    %cst_92 = arith.constant 6.400000e+01 : f32
    %319 = vector.broadcast %cst_92 : f32 to vector<16x1xf32>
    %320 = arith.divf %318, %319 : vector<16x1xf32>
    %321 = arith.mulf %53, %56 : vector<16x64xf32>
    %322 = arith.mulf %52, %57 : vector<16x64xf32>
    %323 = arith.subf %321, %322 : vector<16x64xf32>
    %cst_93 = arith.constant dense<0.000000e+00> : vector<16xf32>
    %324 = vector.multi_reduction <add>, %323, %cst_93 [1] : vector<16x64xf32> to vector<16xf32>
    %325 = vector.shape_cast %324 : vector<16xf32> to vector<16x1xf32>
    %cst_94 = arith.constant 6.400000e+01 : f32
    %326 = vector.broadcast %cst_94 : f32 to vector<16x1xf32>
    %327 = arith.divf %325, %326 : vector<16x1xf32>
    %328 = arith.mulf %54, %54 : vector<16x64xf32>
    %329 = arith.mulf %55, %55 : vector<16x64xf32>
    %330 = arith.addf %328, %329 : vector<16x64xf32>
    %cst_95 = arith.constant dense<0.000000e+00> : vector<16xf32>
    %331 = vector.multi_reduction <add>, %330, %cst_95 [1] : vector<16x64xf32> to vector<16xf32>
    %332 = vector.shape_cast %331 : vector<16xf32> to vector<16x1xf32>
    %cst_96 = arith.constant 6.400000e+01 : f32
    %333 = vector.broadcast %cst_96 : f32 to vector<16x1xf32>
    %334 = arith.divf %332, %333 : vector<16x1xf32>
    %335 = arith.mulf %55, %54 : vector<16x64xf32>
    %336 = arith.mulf %54, %55 : vector<16x64xf32>
    %337 = arith.subf %335, %336 : vector<16x64xf32>
    %cst_97 = arith.constant dense<0.000000e+00> : vector<16xf32>
    %338 = vector.multi_reduction <add>, %337, %cst_97 [1] : vector<16x64xf32> to vector<16xf32>
    %339 = vector.shape_cast %338 : vector<16xf32> to vector<16x1xf32>
    %cst_98 = arith.constant 6.400000e+01 : f32
    %340 = vector.broadcast %cst_98 : f32 to vector<16x1xf32>
    %341 = arith.divf %339, %340 : vector<16x1xf32>
    %342 = arith.mulf %54, %58 : vector<16x64xf32>
    %343 = arith.mulf %55, %59 : vector<16x64xf32>
    %344 = arith.addf %342, %343 : vector<16x64xf32>
    %cst_99 = arith.constant dense<0.000000e+00> : vector<16xf32>
    %345 = vector.multi_reduction <add>, %344, %cst_99 [1] : vector<16x64xf32> to vector<16xf32>
    %346 = vector.shape_cast %345 : vector<16xf32> to vector<16x1xf32>
    %cst_100 = arith.constant 6.400000e+01 : f32
    %347 = vector.broadcast %cst_100 : f32 to vector<16x1xf32>
    %348 = arith.divf %346, %347 : vector<16x1xf32>
    %349 = arith.mulf %55, %58 : vector<16x64xf32>
    %350 = arith.mulf %54, %59 : vector<16x64xf32>
    %351 = arith.subf %349, %350 : vector<16x64xf32>
    %cst_101 = arith.constant dense<0.000000e+00> : vector<16xf32>
    %352 = vector.multi_reduction <add>, %351, %cst_101 [1] : vector<16x64xf32> to vector<16xf32>
    %353 = vector.shape_cast %352 : vector<16xf32> to vector<16x1xf32>
    %cst_102 = arith.constant 6.400000e+01 : f32
    %354 = vector.broadcast %cst_102 : f32 to vector<16x1xf32>
    %355 = arith.divf %353, %354 : vector<16x1xf32>
    %356 = arith.mulf %54, %60 : vector<16x64xf32>
    %357 = arith.mulf %55, %61 : vector<16x64xf32>
    %358 = arith.addf %356, %357 : vector<16x64xf32>
    %cst_103 = arith.constant dense<0.000000e+00> : vector<16xf32>
    %359 = vector.multi_reduction <add>, %358, %cst_103 [1] : vector<16x64xf32> to vector<16xf32>
    %360 = vector.shape_cast %359 : vector<16xf32> to vector<16x1xf32>
    %cst_104 = arith.constant 6.400000e+01 : f32
    %361 = vector.broadcast %cst_104 : f32 to vector<16x1xf32>
    %362 = arith.divf %360, %361 : vector<16x1xf32>
    %363 = arith.mulf %55, %60 : vector<16x64xf32>
    %364 = arith.mulf %54, %61 : vector<16x64xf32>
    %365 = arith.subf %363, %364 : vector<16x64xf32>
    %cst_105 = arith.constant dense<0.000000e+00> : vector<16xf32>
    %366 = vector.multi_reduction <add>, %365, %cst_105 [1] : vector<16x64xf32> to vector<16xf32>
    %367 = vector.shape_cast %366 : vector<16xf32> to vector<16x1xf32>
    %cst_106 = arith.constant 6.400000e+01 : f32
    %368 = vector.broadcast %cst_106 : f32 to vector<16x1xf32>
    %369 = arith.divf %367, %368 : vector<16x1xf32>
    %370 = arith.mulf %56, %56 : vector<16x64xf32>
    %371 = arith.mulf %57, %57 : vector<16x64xf32>
    %372 = arith.addf %370, %371 : vector<16x64xf32>
    %cst_107 = arith.constant dense<0.000000e+00> : vector<16xf32>
    %373 = vector.multi_reduction <add>, %372, %cst_107 [1] : vector<16x64xf32> to vector<16xf32>
    %374 = vector.shape_cast %373 : vector<16xf32> to vector<16x1xf32>
    %cst_108 = arith.constant 6.400000e+01 : f32
    %375 = vector.broadcast %cst_108 : f32 to vector<16x1xf32>
    %376 = arith.divf %374, %375 : vector<16x1xf32>
    %377 = arith.mulf %57, %56 : vector<16x64xf32>
    %378 = arith.mulf %56, %57 : vector<16x64xf32>
    %379 = arith.subf %377, %378 : vector<16x64xf32>
    %cst_109 = arith.constant dense<0.000000e+00> : vector<16xf32>
    %380 = vector.multi_reduction <add>, %379, %cst_109 [1] : vector<16x64xf32> to vector<16xf32>
    %381 = vector.shape_cast %380 : vector<16xf32> to vector<16x1xf32>
    %cst_110 = arith.constant 6.400000e+01 : f32
    %382 = vector.broadcast %cst_110 : f32 to vector<16x1xf32>
    %383 = arith.divf %381, %382 : vector<16x1xf32>
    %384 = arith.mulf %58, %58 : vector<16x64xf32>
    %385 = arith.mulf %59, %59 : vector<16x64xf32>
    %386 = arith.addf %384, %385 : vector<16x64xf32>
    %cst_111 = arith.constant dense<0.000000e+00> : vector<16xf32>
    %387 = vector.multi_reduction <add>, %386, %cst_111 [1] : vector<16x64xf32> to vector<16xf32>
    %388 = vector.shape_cast %387 : vector<16xf32> to vector<16x1xf32>
    %cst_112 = arith.constant 6.400000e+01 : f32
    %389 = vector.broadcast %cst_112 : f32 to vector<16x1xf32>
    %390 = arith.divf %388, %389 : vector<16x1xf32>
    %391 = arith.mulf %59, %58 : vector<16x64xf32>
    %392 = arith.mulf %58, %59 : vector<16x64xf32>
    %393 = arith.subf %391, %392 : vector<16x64xf32>
    %cst_113 = arith.constant dense<0.000000e+00> : vector<16xf32>
    %394 = vector.multi_reduction <add>, %393, %cst_113 [1] : vector<16x64xf32> to vector<16xf32>
    %395 = vector.shape_cast %394 : vector<16xf32> to vector<16x1xf32>
    %cst_114 = arith.constant 6.400000e+01 : f32
    %396 = vector.broadcast %cst_114 : f32 to vector<16x1xf32>
    %397 = arith.divf %395, %396 : vector<16x1xf32>
    %398 = arith.mulf %58, %60 : vector<16x64xf32>
    %399 = arith.mulf %59, %61 : vector<16x64xf32>
    %400 = arith.addf %398, %399 : vector<16x64xf32>
    %cst_115 = arith.constant dense<0.000000e+00> : vector<16xf32>
    %401 = vector.multi_reduction <add>, %400, %cst_115 [1] : vector<16x64xf32> to vector<16xf32>
    %402 = vector.shape_cast %401 : vector<16xf32> to vector<16x1xf32>
    %cst_116 = arith.constant 6.400000e+01 : f32
    %403 = vector.broadcast %cst_116 : f32 to vector<16x1xf32>
    %404 = arith.divf %402, %403 : vector<16x1xf32>
    %405 = arith.mulf %59, %60 : vector<16x64xf32>
    %406 = arith.mulf %58, %61 : vector<16x64xf32>
    %407 = arith.subf %405, %406 : vector<16x64xf32>
    %cst_117 = arith.constant dense<0.000000e+00> : vector<16xf32>
    %408 = vector.multi_reduction <add>, %407, %cst_117 [1] : vector<16x64xf32> to vector<16xf32>
    %409 = vector.shape_cast %408 : vector<16xf32> to vector<16x1xf32>
    %cst_118 = arith.constant 6.400000e+01 : f32
    %410 = vector.broadcast %cst_118 : f32 to vector<16x1xf32>
    %411 = arith.divf %409, %410 : vector<16x1xf32>
    %412 = arith.mulf %60, %60 : vector<16x64xf32>
    %413 = arith.mulf %61, %61 : vector<16x64xf32>
    %414 = arith.addf %412, %413 : vector<16x64xf32>
    %cst_119 = arith.constant dense<0.000000e+00> : vector<16xf32>
    %415 = vector.multi_reduction <add>, %414, %cst_119 [1] : vector<16x64xf32> to vector<16xf32>
    %416 = vector.shape_cast %415 : vector<16xf32> to vector<16x1xf32>
    %cst_120 = arith.constant 6.400000e+01 : f32
    %417 = vector.broadcast %cst_120 : f32 to vector<16x1xf32>
    %418 = arith.divf %416, %417 : vector<16x1xf32>
    %419 = arith.mulf %61, %60 : vector<16x64xf32>
    %420 = arith.mulf %60, %61 : vector<16x64xf32>
    %421 = arith.subf %419, %420 : vector<16x64xf32>
    %cst_121 = arith.constant dense<0.000000e+00> : vector<16xf32>
    %422 = vector.multi_reduction <add>, %421, %cst_121 [1] : vector<16x64xf32> to vector<16xf32>
    %423 = vector.shape_cast %422 : vector<16xf32> to vector<16x1xf32>
    %cst_122 = arith.constant 6.400000e+01 : f32
    %424 = vector.broadcast %cst_122 : f32 to vector<16x1xf32>
    %425 = arith.divf %423, %424 : vector<16x1xf32>
    %cst_123 = arith.constant 0.000000e+00 : f32
    %426 = vector.broadcast %cst_123 : f32 to vector<16x68xf32>
    %427 = tpu.concatenate %26, %30, %34, %38, %39, %40, %41, %45, %68, %82, %96, %110, %124, %138, %152, %166 in 1 : vector<16x1xf32>, vector<16x1xf32>, vector<16x1xf32>, vector<16x1xf32>, vector<16x1xf32>, vector<16x1xf32>, vector<16x1xf32>, vector<16x1xf32>, vector<16x1xf32>, vector<16x1xf32>, vector<16x1xf32>, vector<16x1xf32>, vector<16x1xf32>, vector<16x1xf32>, vector<16x1xf32>, vector<16x1xf32> -> vector<16x16xf32>
    %428 = tpu.concatenate %180, %194, %208, %222, %236, %250, %264, %278, %292, %306, %320, %334, %348, %362, %376, %390 in 1 : vector<16x1xf32>, vector<16x1xf32>, vector<16x1xf32>, vector<16x1xf32>, vector<16x1xf32>, vector<16x1xf32>, vector<16x1xf32>, vector<16x1xf32>, vector<16x1xf32>, vector<16x1xf32>, vector<16x1xf32>, vector<16x1xf32>, vector<16x1xf32>, vector<16x1xf32>, vector<16x1xf32>, vector<16x1xf32> -> vector<16x16xf32>
    %429 = tpu.concatenate %404, %418, %75, %89, %103, %117, %131, %145, %159, %173, %187, %201, %215, %229, %243, %257 in 1 : vector<16x1xf32>, vector<16x1xf32>, vector<16x1xf32>, vector<16x1xf32>, vector<16x1xf32>, vector<16x1xf32>, vector<16x1xf32>, vector<16x1xf32>, vector<16x1xf32>, vector<16x1xf32>, vector<16x1xf32>, vector<16x1xf32>, vector<16x1xf32>, vector<16x1xf32>, vector<16x1xf32>, vector<16x1xf32> -> vector<16x16xf32>
    %430 = tpu.concatenate %271, %285, %299, %313, %327, %341, %355, %369, %383, %397, %411, %425, %426 in 1 : vector<16x1xf32>, vector<16x1xf32>, vector<16x1xf32>, vector<16x1xf32>, vector<16x1xf32>, vector<16x1xf32>, vector<16x1xf32>, vector<16x1xf32>, vector<16x1xf32>, vector<16x1xf32>, vector<16x1xf32>, vector<16x1xf32>, vector<16x68xf32> -> vector<16x80xf32>
    %431 = tpu.concatenate %427, %428, %429, %430 in 1 : vector<16x16xf32>, vector<16x16xf32>, vector<16x16xf32>, vector<16x80xf32> -> vector<16x128xf32>
    %c0_124 = arith.constant 0 : index
    %c0_125 = arith.constant 0 : index
    %432 = vector.load %arg4[%c0_124, %c0_125] : memref<16x128xf32, #tpu.memory_space<vmem>>, vector<16x128xf32>
    tpu.vector_store %arg4[%c0_124, %c0_125], %431 {strides = array<i32>} : memref<16x128xf32, #tpu.memory_space<vmem>>, vector<16x128xf32>,
    return
  }
  func.func @transform_0(%arg0: i32) -> (i32, i32) {
    %c0_i32 = arith.constant 0 : i32
    %c0_i32_0 = arith.constant 0 : i32
    return %arg0, %c0_i32 : i32, i32
  }
  func.func @transform_1(%arg0: i32) -> (i32, i32) {
    %c0_i32 = arith.constant 0 : i32
    %c0_i32_0 = arith.constant 0 : i32
    %c0_i32_1 = arith.constant 0 : i32
    return %c0_i32, %c0_i32_0 : i32, i32
  }
  func.func @transform_2(%arg0: i32) -> (i32, i32) {
    %c0_i32 = arith.constant 0 : i32
    %c0_i32_0 = arith.constant 0 : i32
    %c0_i32_1 = arith.constant 0 : i32
    return %c0_i32, %c0_i32_0 : i32, i32
  }
  func.func @transform_3(%arg0: i32) -> (i32, i32) {
    %c0_i32 = arith.constant 0 : i32
    %c0_i32_0 = arith.constant 0 : i32
    return %arg0, %c0_i32 : i32, i32
  }
}

</mosaic_0001>

<bundles_post_ra>
// kernel: tpu_custom_call.1
= control target key start
LH: loop header
LB: loop body
LE: loop exit
PB: predicated region body
PF: predicated region fallthrough
CT: control target
= control target key end

     0   :  { %8 = vsyncpa [#allocation3], 0  ;;  %s3567_s0 = inlined_call_operand.hbm [shape: bf16[32,64], index: 0, kind: input, shape index: {}]   ;;  %s3568_s1 = inlined_call_operand.hbm [shape: bf16[64,512], index: 1, kind: input, shape index: {}]   ;;  %s3569_s2 = inlined_call_operand.hbm [shape: bf16[64,512], index: 2, kind: input, shape index: {}]   ;;  %s3570_s3 = inlined_call_operand.hbm [shape: f32[32,128], index: 3, kind: output, shape index: {}]  }
   0x1   :  { %10 = vsyncpa [#allocation3 + $0x1], 0 }
   0x2   :  { %11 = vsyncpa [#allocation6], 0 }
   0x3   :  { %12 = vsyncpa [#allocation4], 0 }
   0x4   :  { %14 = vsyncpa [#allocation4 + $0x1], 0  ;;  %s2325_s12 = smov 0   ;;  %s2327_s13 = smov 0  }
   0x5   :  { %s2329_s14 = smov 0   ;;  %s2331_s15 = smov 0  }
   0x6 LB: > { %s2346_s16 = sadd.s32 4294967295, %s2290_s15   ;;  %s1841_s17 = sadd.s32 4294967294, %s2290_s15   ;;  %s2290_s15 = sphi %s2331_s15, %s3664_s15   ;;  %s2286_s14 = sphi %s2329_s14, %s3663_s14   ;;  %s2282_s13 = sphi %s2327_s13, %s3662_s13   ;;  %s2278_s12 = sphi %s2325_s12, %s3661_s12  }
   0x7   : > { %p40_p0 = scmp.ne.s32.totalorder %s2282_s13, %s2278_s12  ;;  %p41_p1 = scmp.eq.s32.totalorder %s2346_s16, 0 }
   0x8   : > { %p106_p2 = scmp.eq.s32.totalorder %s2346_s16, 1  ;;  %p112_p3 = scmp.eq.s32.totalorder %s1841_s17, 1 }
   0x9   : > { %p2355_p4 = por %p41_p1, %p40_p0  ;;  %p1842_p5 = scmp.ge.s32.totalorder %s2290_s15, 1 }
   0xa   : > { %p2360_p6 = por %p112_p3, %p40_p0  ;;  %p119_p7 = scmp.lt.s32.totalorder %s2290_s15, 3 }
   0xb   : > { %s130_s22 = sshll.u32 %s3568_s1, 4  ;;  %s2292_s24 = smov [#allocation5]   ;;  %s131_s22 = int_to_ptr.hbm [resolvable:$true] %s130_s22 }
   0xc   : > { %p2368_p8 = pnand %p1842_p5, %p119_p7  ;;  %s132_s25 = sshll.u32 %s2292_s24, 4  ;;  %s133_s25 = int_to_ptr.vmem [resolvable:$true] %s132_s25 }
   0xd   : > { %s144_s28 = sshll.u32 %s3569_s2, 4  ;;  %s2293_s29 = smov 256   ;;  %s145_s28 = int_to_ptr.hbm [resolvable:$true] %s144_s28 }
   0xe   : > { %p2054_p9 = pneg %p2368_p8  ;;  %s2294_s30 = smov 16  }
   0xf   : > { %s2295_s4 = smov [#allocation7]   ;;  %s2381_s6 = sadd.s32 1, %s2290_s15  }
  0x10   : > { %p2055_p10 = pnand %p2054_p9, %p41_p1  ;;  %s146_s5 = sshll.u32 %s2295_s4, 4  ;;  %s147_s5 = int_to_ptr.vmem [resolvable:$true] %s146_s5 }
  0x11   : > { %s27_s7 = sadd.s32 1, %s2286_s14  ;;  %s24_s8 = ssub.s32 %s2290_s15, %s2381_s6 }
  0x12   : > { %2057 = dma.hbm_to_vmem [thread:$0]  (!%p2055_p10), %s131_s22, 2048, %s133_s25, [#allocation6], %s2293_s29, %s2293_s29, %s2294_s30  }
  0x13   : > { %2060 = dma.hbm_to_vmem [thread:$0]  (!%p2055_p10), %s145_s28, 2048, %s147_s5, [#allocation6], %s2293_s29, %s2293_s29, %s2294_s30  }
  0x14   : > { %p34_p12 = scmp.ne.s32.totalorder %s2286_s14, %s2282_s13  ;;  %p25_p13 = scmp.eq.s32.totalorder %s24_s8, 0 }
  0x15   : > { %p35_p0 = scmp.eq.s32.totalorder %s2290_s15, 0  ;;  %p2071_p5 = scmp.lt.s32.totalorder %s2290_s15, 2 }
  0x16   : > { %p2391_p3 = por %p106_p2, %p34_p12  ;;  %s160_s11 = sand.u32 1, %s2286_s14  }
  0x17   : > { %s2397_s10 = scalar_select %p25_p13, %s2286_s14, %s27_s7  }
  0x18   : > { %p36_p7 = por %p35_p0, %p34_p12  ;;  %s1846_s17 = sshll.u32 %s160_s11, 3 }
  0x19   : > { %s2007_s20 = sshll.u32 %s2290_s15, 3  ;;  %s164_s25 = scalar_lea.vmem [#allocation2], %s1846_s17 }
  0x1a   : > { %s169_s24 = scalar_lea.hbm %s3567_s0, %s2007_s20  ;;  %s172_s26 = sshll.u32 %s164_s25, 4  ;;  %s173_s26 = int_to_ptr.vmem [resolvable:$true] %s172_s26 }
  0x1b   : > { %s170_s27 = sshll.u32 %s169_s24, 4  ;;  %p2404_p2 = pnand %p2071_p5, %p36_p7  ;;  %s171_s27 = int_to_ptr.hbm [resolvable:$true] %s170_s27 }
  0x1c   : > { %s161_s29 = scalar_lea.sflag [#allocation3], %s160_s11  ;;  %s2190_s30 = sshra.s32 %s171_s27, 4  ;;  %s2191_s30 = int_to_ptr.hbm [resolvable:$true] %s2190_s30 }
  0x1d   : > { %s2192_s4 = scalar_lea.hbm %s2191_s30, 8  ;;  %p2194_p10 = pneg %p2404_p2 }
  0x1e   : > { %p2193_p9 = scmp.ne.s32.totalorder %s2191_s30, %s2192_s4  ;;  %s2197_s8 = scalar_lea.hbm %s3567_s0, 16 }
  0x1f   : > { %p2198_p0 = scmp.lt.s32.totalorder %s2191_s30, %s3567_s0  ;;  %p2199_p5 = scmp.lt.s32.totalorder %s2197_s8, %s2192_s4 }
  0x20   : > { %p2195_p12 = pnand %p2194_p10, %p2193_p9 }
  0x21   : > { %p2200_p7 = por %p2199_p5, %p2198_p0 }
  0x22   : > { %p2196_p13 = pneg %p2195_p12 }
  0x24   : > { %p2201_p11 = pnand %p2200_p7, %p2196_p13 }
  0x26   : > { %2204 = shalt.err (!%p2201_p11)
}
  0x27   : > { %s2296_s11 = smov 64   ;;  %s2297_s21 = smov 4  }
  0x28   : > { %2064 = dma.hbm_to_vmem [thread:$0]  (!%p2404_p2), %s171_s27, 128, %s173_s26, %s161_s29, %s2296_s11, %s2296_s11, %s2297_s21  }
  0x29   : > { %184 = sbr.rel (%p2368_p8) target bundleno = 3165 (0xc5d), region = 32 }
  0x2e   : > { %s2421_s22 = sand.u32 1, %s2282_s13  }
  0x2f   : > { %s1850_s24 = sshll.u32 %s2421_s22, 3  ;;  %s187_s25 = scalar_lea.sflag [#allocation3], %s2421_s22 }
  0x30   : > { %s2425_s30 = scalar_lea.vmem [#allocation2], %s1850_s24 }
  0x31   : > { %2265 = dma.done.wait (%p2355_p4), %s187_s25, 128  }
  0x32   : > { %2267 = vsyncadd (%p2355_p4), %s187_s25, 4294967168 }
  0x33   : > { %2269 = dma.done.wait (%p41_p1), [#allocation6], 4096  }
  0x34   : > { %2271 = vsyncadd (%p41_p1), [#allocation6], 4294963200  ;;  %v1908_v0 = vld [vmem:[#allocation5 + $0x60] sm:$0xf]  ;;  %v2023_v1 = vld [vmem:[#allocation5 + $0x6c] sm:$0xf0] }
  0x35   : > { %v2021_v2 = vld [vmem:[#allocation5 + $0x64] sm:$0xf]  ;;  %v1909_v3 = vor.u32 %v2023_v1, %v1908_v0  ;;  %v1910_v4 = vld [vmem:[#allocation5 + $0x70] sm:$0xf0]  ;;  %v1916_v5 = vld [vmem:[#allocation5 + $0x68] sm:$0xf] }
  0x36   : > { %v2024_v6 = vld [vmem:[#allocation5 + $0x74] sm:$0xf0]  ;;  %v1913_v7 = vor.u32 %v2021_v2, %v1910_v4  ;;  %v2022_v9 = vld [vmem:[#allocation5 + $0x6c] sm:$0xf]  ;;  %v1918_v10 = vld [vmem:[#allocation5 + $0x78] sm:$0xf0] }
  0x37   : > { %v1917_v8 = vor.u32 %v2024_v6, %v1916_v5  ;;  %v1892_v11 = vld [vmem:[#allocation5 + $0x40] sm:$0xf]  ;;  %338 = vmatpush.bf16.msra.mxu0 %v1909_v3  ;;  %v1921_v12 = vor.u32 %v2022_v9, %v1918_v10  ;;  %v2019_v13 = vld [vmem:[#allocation5 + $0x4c] sm:$0xf0]  ;;  %v2017_v14 = vld [vmem:[#allocation5 + $0x44] sm:$0xf] }
  0x38   : > { %v1894_v15 = vld [vmem:[#allocation5 + $0x50] sm:$0xf0]  ;;  %352 = vmatpush.bf16.msra.mxu1 %v1913_v7  ;;  %v1893_v16 = vor.u32 %v2019_v13, %v1892_v11  ;;  %v1900_v18 = vld [vmem:[#allocation5 + $0x48] sm:$0xf]  ;;  %v2020_v19 = vld [vmem:[#allocation5 + $0x54] sm:$0xf0] }
  0x39   : > { %366 = vmatpush.bf16.msra.mxu2 %v1917_v8  ;;  %v1897_v17 = vor.u32 %v2017_v14, %v1894_v15  ;;  %v2018_v20 = vld [vmem:[#allocation5 + $0x4c] sm:$0xf]  ;;  %380 = vmatpush.bf16.msra.mxu3 %v1921_v12  ;;  %v1901_v21 = vor.u32 %v2020_v19, %v1900_v18  ;;  %v1902_v22 = vld [vmem:[#allocation5 + $0x58] sm:$0xf0]  ;;  %v1876_v23 = vld [vmem:[#allocation5 + $0x20] sm:$0xf] }
  0x3a   : > { %v2015_v24 = vld [vmem:[#allocation5 + $0x2c] sm:$0xf0]  ;;  %v1905_v25 = vor.u32 %v2018_v20, %v1902_v22  ;;  %v2013_v26 = vld [vmem:[#allocation5 + $0x24] sm:$0xf]  ;;  %v1878_v27 = vld [vmem:[#allocation5 + $0x30] sm:$0xf0] }
  0x3b   : > { %v1884_v28 = vld [vmem:[#allocation5 + $0x28] sm:$0xf]  ;;  %339 = vmatpush.bf16.msra.mxu0 %v1893_v16  ;;  %v1877_v29 = vor.u32 %v2015_v24, %v1876_v23  ;;  %v2016_v30 = vld [vmem:[#allocation5 + $0x34] sm:$0xf0]  ;;  %v2014_v31 = vld [vmem:[#allocation5 + $0x2c] sm:$0xf]  ;;  %v1881_v33 = vor.u32 %v2013_v26, %v1878_v27 }
  0x3c   : > { %v1886_v32 = vld [vmem:[#allocation5 + $0x38] sm:$0xf0]  ;;  %353 = vmatpush.bf16.msra.mxu1 %v1897_v17  ;;  %v1885_v34 = vor.u32 %v2016_v30, %v1884_v28  ;;  %v1860_v35 = vld [vmem:[#allocation5] sm:$0xf]  ;;  %v2011_v36 = vld [vmem:[#allocation5 + $0xc] sm:$0xf0] }
  0x3d   : > { %367 = vmatpush.bf16.msra.mxu2 %v1901_v21  ;;  %v2009_v37 = vld [vmem:[#allocation5 + $0x4] sm:$0xf]  ;;  %381 = vmatpush.bf16.msra.mxu3 %v1905_v25  ;;  %v1889_v38 = vor.u32 %v2014_v31, %v1886_v32  ;;  %v1862_v39 = vld [vmem:[#allocation5 + $0x10] sm:$0xf0]  ;;  %v1868_v40 = vld [vmem:[#allocation5 + $0x8] sm:$0xf]  ;;  %v1861_v44 = vor.u32 %v2011_v36, %v1860_v35 }
  0x3e   : > { %v2012_v41 = vld [vmem:[#allocation5 + $0x14] sm:$0xf0]  ;;  %v2010_v42 = vld [vmem:[#allocation5 + $0xc] sm:$0xf]  ;;  %v1870_v43 = vld [vmem:[#allocation5 + $0x18] sm:$0xf0]  ;;  %v1865_v45 = vor.u32 %v2009_v37, %v1862_v39 }
  0x3f   : > { %340 = vmatpush.bf16.msra.mxu0 %v1877_v29  ;;  %v1869_v46 = vor.u32 %v2012_v41, %v1868_v40  ;;  %v1873_v47 = vor.u32 %v2010_v42, %v1870_v43  ;;  %v2008_v48 = vld [vmem:[%s2425_s30] sm:$0xff]  ;;  %vm330_vm0 = vcmask 523264   ;;  %v1976_v49 = vld [vmem:[#allocation7 + $0x60] sm:$0xf]  ;;  %v2037_v51 = vld [vmem:[#allocation7 + $0x64] sm:$0xf] }
  0x40   : > { %354 = vmatpush.bf16.msra.mxu1 %v1881_v33  ;;  %v2039_v50 = vld [vmem:[#allocation7 + $0x6c] sm:$0xf0]  ;;  %v1978_v53 = vld [vmem:[#allocation7 + $0x70] sm:$0xf0]  ;;  %v1984_v54 = vld [vmem:[#allocation7 + $0x68] sm:$0xf] }
  0x41   : > { %368 = vmatpush.bf16.msra.mxu2 %v1885_v34  ;;  %382 = vmatpush.bf16.msra.mxu3 %v1889_v38  ;;  %v1977_v52 = vor.u32 %v2039_v50, %v1976_v49  ;;  %v2040_v55 = vld [vmem:[#allocation7 + $0x74] sm:$0xf0]  ;;  %v1981_v56 = vor.u32 %v2037_v51, %v1978_v53  ;;  %v2038_v58 = vld [vmem:[#allocation7 + $0x6c] sm:$0xf]  ;;  %v1986_v59 = vld [vmem:[#allocation7 + $0x78] sm:$0xf0] }
  0x42   : > { %v1985_v57 = vor.u32 %v2040_v55, %v1984_v54  ;;  %v1960_v60 = vld [vmem:[#allocation7 + $0x40] sm:$0xf]  ;;  %v1989_v61 = vor.u32 %v2038_v58, %v1986_v59  ;;  %v2035_v62 = vld [vmem:[#allocation7 + $0x4c] sm:$0xf0]  ;;  %v2033_v63 = vld [vmem:[#allocation7 + $0x44] sm:$0xf] }
  0x43   : > { %341 = vmatpush.bf16.msra.mxu0 %v1861_v44  ;;  %v1962_v0 = vld [vmem:[#allocation7 + $0x50] sm:$0xf0]  ;;  %v1961_v1 = vor.u32 %v2035_v62, %v1960_v60  ;;  %v1968_v3 = vld [vmem:[#allocation7 + $0x48] sm:$0xf]  ;;  %v2036_v4 = vld [vmem:[#allocation7 + $0x54] sm:$0xf0] }
  0x44   : > { %355 = vmatpush.bf16.msra.mxu1 %v1865_v45  ;;  %v1965_v2 = vor.u32 %v2033_v63, %v1962_v0  ;;  %v2034_v5 = vld [vmem:[#allocation7 + $0x4c] sm:$0xf]  ;;  %v1969_v6 = vor.u32 %v2036_v4, %v1968_v3  ;;  %v1970_v7 = vld [vmem:[#allocation7 + $0x58] sm:$0xf0]  ;;  %s2298_s18 = smov 64   ;;  %vm1569_vm10 = vcmask 7168  }
  0x45   : > { %369 = vmatpush.bf16.msra.mxu2 %v1869_v46  ;;  %383 = vmatpush.bf16.msra.mxu3 %v1873_v47  ;;  %v1973_v8 = vor.u32 %v2034_v5, %v1970_v7  ;;  %v1944_v11 = vld [vmem:[#allocation7 + $0x20] sm:$0xf]  ;;  %v2031_v12 = vld [vmem:[#allocation7 + $0x2c] sm:$0xf0]  ;;  %v2029_v13 = vld [vmem:[#allocation7 + $0x24] sm:$0xf] }
  0x46   : > { %1922 = vmatmul.msk.bf16.vlgmr.msra.gmra.mxu0 %vm330_vm0, %v2008_v48  ;;  %v1945_v14 = vor.u32 %v2031_v12, %v1944_v11  ;;  %v1946_v15 = vld [vmem:[#allocation7 + $0x30] sm:$0xf0]  ;;  %v1952_v16 = vld [vmem:[#allocation7 + $0x28] sm:$0xf]  ;;  %v2032_v17 = vld [vmem:[#allocation7 + $0x34] sm:$0xf0] }
  0x47   : > { %1923 = vmatmul.msk.bf16.vlgmr.msra.gmra.mxu1 %vm330_vm0, %v2008_v48  ;;  %633 = vmatpush.bf16.msrb.mxu0 %v1977_v52  ;;  %v1949_v18 = vor.u32 %v2029_v13, %v1946_v15  ;;  %v1953_v19 = vor.u32 %v2032_v17, %v1952_v16  ;;  %v2030_v20 = vld [vmem:[#allocation7 + $0x2c] sm:$0xf]  ;;  %v1954_v21 = vld [vmem:[#allocation7 + $0x38] sm:$0xf0]  ;;  %v1928_v22 = vld [vmem:[#allocation7] sm:$0xf] }
  0x48   : > { %1924 = vmatmul.msk.bf16.vlgmr.msra.gmra.mxu2 %vm330_vm0, %v2008_v48  ;;  %1925 = vmatmul.msk.bf16.vlgmr.msra.gmra.mxu3 %vm330_vm0, %v2008_v48  ;;  %v1957_v23 = vor.u32 %v2030_v20, %v1954_v21  ;;  %v2027_v24 = vld [vmem:[#allocation7 + $0xc] sm:$0xf0]  ;;  %v2025_v25 = vld [vmem:[#allocation7 + $0x4] sm:$0xf]  ;;  %v1930_v26 = vld [vmem:[#allocation7 + $0x10] sm:$0xf0] }
  0x49   : > { %653 = vmatpush.bf16.msrb.mxu1 %v1981_v56  ;;  %677 = vmatpush.bf16.msrb.mxu2 %v1985_v57  ;;  %v1929_v27 = vor.u32 %v2027_v24, %v1928_v22  ;;  %v1936_v28 = vld [vmem:[#allocation7 + $0x8] sm:$0xf]  ;;  %v2028_v29 = vld [vmem:[#allocation7 + $0x14] sm:$0xf0]  ;;  %v2026_v30 = vld [vmem:[#allocation7 + $0xc] sm:$0xf]  ;;  %v1933_v32 = vor.u32 %v2025_v25, %v1930_v26 }
  0x4a   : > { %697 = vmatpush.bf16.msrb.mxu3 %v1989_v61  ;;  %v1937_v33 = vor.u32 %v2028_v29, %v1936_v28  ;;  %v1938_v34 = vld [vmem:[#allocation7 + $0x18] sm:$0xf0]  ;;  %vm1572_vm11 = vcmask 15360   ;;  %vm1575_vm12 = vcmask 23552   ;;  %vm1578_vm13 = vcmask 31744   ;;  %s2300_s23 = smov 16  }
  0x4b   : > { %634 = vmatpush.bf16.msrb.mxu0 %v1961_v1  ;;  %v1941_v36 = vor.u32 %v2026_v30, %v1938_v34  ;;  %vm1581_vm14 = vcmask 39936   ;;  %vm1584_vm15 = vcmask 48128   ;;  %s2301_s26 = smov 32   ;;  %s2302_s27 = smov 48  }
  0x4c   : > { %s1853_s28 = sshll.u32 %s2421_s22, 4  ;;  %s2041_s4 = sshll.u32 %s2346_s16, 4 }
  0x4d   : > { %654 = vmatpush.bf16.msrb.mxu1 %v1965_v2  ;;  %678 = vmatpush.bf16.msrb.mxu2 %v1969_v6  ;;  %s223_s29 = scalar_lea.vmem [#allocation8], %s1853_s28  ;;  %s1745_s8 = scalar_lea.hbm %s3570_s3, %s2041_s4 }
  0x4e   : > { %698 = vmatpush.bf16.msrb.mxu3 %v1973_v8  ;;  %s1746_s17 = sshll.u32 %s223_s29, 4  ;;  %s1748_s20 = sshll.u32 %s1745_s8, 4  ;;  %s1747_s17 = int_to_ptr.vmem [resolvable:$true] %s1746_s17  ;;  %s1749_s20 = int_to_ptr.hbm [resolvable:$true] %s1748_s20 }
  0x4f   : > { %635 = vmatpush.bf16.msrb.mxu0 %v1945_v14  ;;  %s1734_s11 = scalar_lea.sflag [#allocation4], %s2421_s22  ;;  %s2234_s21 = sshra.s32 %s1749_s20, 4  ;;  %s2235_s21 = int_to_ptr.hbm [resolvable:$true] %s2234_s21 }
  0x50   : > { %s2236_s16 = scalar_lea.hbm %s2235_s21, 16  ;;  %s2240_s30 = scalar_lea.hbm %s3570_s3, 32 }
  0x51   : > { %655 = vmatpush.bf16.msrb.mxu1 %v1949_v18  ;;  %679 = vmatpush.bf16.msrb.mxu2 %v1953_v19  ;;  %p2237_p1 = scmp.ne.s32.totalorder %s2235_s21, %s2236_s16  ;;  %p2241_p11 = scmp.lt.s32.totalorder %s2235_s21, %s3570_s3 }
  0x52   : > { %699 = vmatpush.bf16.msrb.mxu3 %v1957_v23  ;;  %p2242_p2 = scmp.lt.s32.totalorder %s2240_s30, %s2236_s16 }
  0x53   : > { %636 = vmatpush.bf16.msrb.mxu0 %v1929_v27  ;;  %p2238_p4 = pnand %p2237_p1, %p2391_p3 }
  0x54   : > { %p2243_p9 = por %p2242_p2, %p2241_p11 }
  0x55   : > { %656 = vmatpush.bf16.msrb.mxu1 %v1933_v32  ;;  %680 = vmatpush.bf16.msrb.mxu2 %v1937_v33  ;;  %p2239_p8 = pneg %p2238_p4 }
  0x56   : > { %700 = vmatpush.bf16.msrb.mxu3 %v1941_v36 }
  0x57   : > { %p2244_p10 = pnand %p2243_p9, %p2239_p8 }
  0xc3   : > { %v2440_v9 = vpop.f32.mrf.mxu0 }
  0xc4   : > { %v2442_v10 = vpop.f32.mrf.mxu1  ;;  %739 = vrot.lane.b32.xlu0 %v2440_v9, %s2298_s18  ;;  %v390_v31 = vmul.f32 %v2440_v9, %v2440_v9 }
  0xc5   : > { %491 = vrot.lane.b32.xlu2 %v2442_v10, %s2298_s18  ;;  %v781_v15 = vmul.f32 %v2442_v10, %v2440_v9  ;;  %v420_v34 = vmul.f32 %v2442_v10, %v2442_v10 }
  0xcb   : > { %v2450_v35 = vpop.f32.mrf.mxu2  ;;  %v2454_v38 = vpop.f32.mrf.mxu3 }
  0xcc   : > { %v392_v37 = vmul.f32 %v2450_v35, %v2450_v35  ;;  %507 = vrot.lane.b32.xlu1 %v2454_v38, %s2298_s18  ;;  %749 = vrot.lane.b32.xlu0 %v2450_v35, %s2298_s18  ;;  %v2462_v40 = vpop.f32.mrf.mxu0  ;;  %v2471_v43 = vpop.f32.mrf.mxu1  ;;  %v725_v46 = vmul.f32 %v2450_v35, %v2440_v9  ;;  %v783_v16 = vmul.f32 %v2454_v38, %v2450_v35 }
  0xcd   : > { %v391_v41 = vmul.f32 %v2462_v40, %v2462_v40  ;;  %v421_v3 = vmul.f32 %v2471_v43, %v2471_v43  ;;  %v795_v21 = vmul.f32 %v2450_v35, %v2442_v10  ;;  %v797_v22 = vmul.f32 %v2454_v38, %v2440_v9 }
  0xce   : > { %v2460_v39 = vadd.f32 %v392_v37, %v390_v31  ;;  %v727_v51 = vsub.f32 %v725_v46, %v725_v46  ;;  %v2532_v18 = vadd.f32 %v783_v16, %v781_v15  ;;  %v422_v36 = vmul.f32 %v2454_v38, %v2454_v38 }
  0xcf   : > { %v2540_v24 = vsub.f32 %v795_v21, %v797_v22 }
  0xd0   : > { %839 = vrot.lane.b32.xlu2 %v2460_v39, %s2298_s18  ;;  %2120 = vrsqrt.f32 %v2460_v39  ;;  %vm403_vm1 = vcmp.eq.f32.partialorder %v2460_v39, inf  ;;  %v406_v58 = vand.u32 2147483648, %v2460_v39  ;;  %vm405_vm2 = vcmp.eq.f32.partialorder %v2460_v39, 0.0 }
  0xd1   : > { %v729_v14 = vsel %vm330_vm0, %v727_v51, 0.0  ;;  %v787_v20 = vsel %vm330_vm0, %v2532_v18, 0.0  ;;  %v717_v26 = vsel %vm330_vm0, %v2460_v39, 0.0  ;;  %v801_v27 = vsel %vm330_vm0, %v2540_v24, 0.0 }
  0xd2   : > { %v2565_v37 = vadd.f32 %v422_v36, %v420_v34 }
  0xd3   : > { %v2469_v42 = vpop.f32.mrf.mxu2  ;;  %v2498_v63 = vpop.f32.mrf.mxu3 }
  0xd4   : > { %v393_v44 = vmul.f32 %v2469_v42, %v2469_v42  ;;  %741 = vrot.lane.b32.xlu1 %v2462_v40, %s2298_s18  ;;  %493 = vrot.lane.b32.xlu0 %v2471_v43, %s2298_s18  ;;  %v726_v45 = vmul.f32 %v2469_v42, %v2462_v40  ;;  %v423_v4 = vmul.f32 %v2498_v63, %v2498_v63  ;;  %vm433_vm7 = vcmp.eq.f32.partialorder %v2565_v37, inf }
  0xd5   : > { %v436_v21 = vand.u32 2147483648, %v2565_v37  ;;  %vm435_vm8 = vcmp.eq.f32.partialorder %v2565_v37, 0.0 }
  0xd6   : > { %v2121_v47 = vpop.eup %2120  ;;  %v2483_v48 = vadd.f32 %v393_v44, %v391_v41  ;;  %v2487_v50 = vsub.f32 %v726_v45, %v726_v45  ;;  %v2513_v8 = vadd.f32 %v423_v4, %v421_v3  ;;  %v782_v44 = vmul.f32 %v2471_v43, %v2462_v40 }
  0xd7   : > { %v397_v49 = vmul.f32 %v2121_v47, %v2460_v39  ;;  %v784_v45 = vmul.f32 %v2498_v63, %v2469_v42 }
  0xd8   : > { %2122 = vrsqrt.f32 %v2483_v48  ;;  %vm415_vm3 = vcmp.eq.f32.partialorder %v2483_v48, inf  ;;  %v418_v5 = vand.u32 2147483648, %v2483_v48  ;;  %vm417_vm4 = vcmp.eq.f32.partialorder %v2483_v48, 0.0 }
  0xd9   : > { %v398_v52 = vmul.f32 %v2121_v47, %v397_v49  ;;  %2124 = vrsqrt.f32 %v2513_v8  ;;  %vm445_vm5 = vcmp.eq.f32.partialorder %v2513_v8, inf  ;;  %v448_v31 = vand.u32 2147483648, %v2513_v8 }
  0xda   : > { %vm447_vm6 = vcmp.eq.f32.partialorder %v2513_v8, 0.0  ;;  %2126 = vrsqrt.f32 %v2565_v37  ;;  %v732_v3 = vsel %vm330_vm0, %v2487_v50, 0.0 }
  0xdb   : > { %v399_v53 = vmul.f32 0.5, %v398_v52 }
  0xdc   : > { %857 = vrot.lane.b32.xlu1 %v2487_v50, %s2298_s18  ;;  %855 = vrot.lane.b32.xlu0 %v727_v51, %s2298_s18 }
  0xdd   : > { %v400_v54 = vsub.f32 1.5, %v399_v53  ;;  %v796_v53 = vmul.f32 %v2469_v42, %v2471_v43 }
  0xde   : > { %v2123_v55 = vpop.eup %2122 }
  0xdf   : > { %v401_v56 = vmul.f32 %v2121_v47, %v400_v54  ;;  %v409_v57 = vmul.f32 %v2123_v55, %v2483_v48  ;;  %v2125_v13 = vpop.eup %2124  ;;  %v2576_v47 = vadd.f32 %v784_v45, %v782_v44  ;;  %v798_v54 = vmul.f32 %v2498_v63, %v2462_v40 }
  0xe0   : > { %v439_v17 = vmul.f32 %v2125_v13, %v2513_v8  ;;  %v2127_v46 = vpop.eup %2126 }
  0xe1   : > { %v402_v59 = vmul.f32 %v401_v56, %v2460_v39  ;;  %v410_v60 = vmul.f32 %v2123_v55, %v409_v57  ;;  %v427_v49 = vmul.f32 %v2127_v46, %v2565_v37  ;;  %v790_v52 = vsel %vm330_vm0, %v2576_v47, 0.0 }
  0xe2   : > { %v440_v19 = vmul.f32 %v2125_v13, %v439_v17  ;;  %v720_v57 = vsel %vm330_vm0, %v2483_v48, 0.0 }
  0xe3   : > { %v404_v61 = vsel %vm403_vm1, %v2460_v39, %v402_v59  ;;  %v411_v62 = vmul.f32 0.5, %v410_v60  ;;  %v428_v56 = vmul.f32 %v2127_v46, %v427_v49  ;;  %vm1587_vm1 = vcmask 56320  }
  0xe4   : > { %v2500_v0 = vsel %vm405_vm2, %v406_v58, %v404_v61  ;;  %v441_v23 = vmul.f32 0.5, %v440_v19  ;;  %v2591_v58 = vsub.f32 %v796_v53, %v798_v54  ;;  %vm1590_vm2 = vcmask 64512  }
  0xe5   : > { %467 = vrot.lane.b32.xlu1 %v2500_v0, %s2298_s18  ;;  %v412_v1 = vsub.f32 1.5, %v411_v62  ;;  %v429_v59 = vmul.f32 0.5, %v428_v56  ;;  %v450_v15 = vsel %vm330_vm0, %v2500_v0, 0.0 }
  0xe6   : > { %v442_v25 = vsub.f32 1.5, %v441_v23  ;;  %v804_v61 = vsel %vm330_vm0, %v2591_v58, 0.0 }
  0xe7   : > { %v413_v2 = vmul.f32 %v2123_v55, %v412_v1  ;;  %v430_v62 = vsub.f32 1.5, %v429_v59 }
  0xe8   : > { %v443_v28 = vmul.f32 %v2125_v13, %v442_v25 }
  0xe9   : > { %v414_v6 = vmul.f32 %v413_v2, %v2483_v48 }
  0xea   : > { %v444_v29 = vmul.f32 %v443_v28, %v2513_v8 }
  0xeb   : > { %v416_v7 = vsel %vm415_vm3, %v2483_v48, %v414_v6  ;;  %vm1593_vm3 = vcmask 72704  }
  0xec   : > { %v2515_v11 = vsel %vm417_vm4, %v418_v5, %v416_v7  ;;  %v446_v30 = vsel %vm445_vm5, %v2513_v8, %v444_v29  ;;  %v431_v5 = vmul.f32 %v2127_v46, %v430_v62  ;;  %vm1596_vm4 = vcmask 80896  }
  0xed   : > { %469 = vrot.lane.b32.xlu1 %v2515_v11, %s2298_s18  ;;  %v521_v12 = vpack.c.bf16 %v2515_v11, %v2500_v0  ;;  %v2551_v32 = vsel %vm447_vm6, %v448_v31, %v446_v30  ;;  %v453_v30 = vsel %vm330_vm0, %v2515_v11, 0.0  ;;  %vm1599_vm5 = vcmask 89088  }
  0xee   : > { %v484_v33 = vsel %vm330_vm0, %v2551_v32, 0.0  ;;  %v432_v50 = vmul.f32 %v431_v5, %v2565_v37  ;;  %vm1602_vm6 = vcmask 97280  }
  0xef   : > { %1990 = vmatmul.msk.bf16.vlgmr.msrb.gmra.mxu0 %vm330_vm0, %v521_v12  ;;  %1993 = vmatmul.msk.bf16.vlgmr.msrb.gmra.mxu1 %vm330_vm0, %v521_v12 }
  0xf0   : > { %1996 = vmatmul.msk.bf16.vlgmr.msrb.gmra.mxu2 %vm330_vm0, %v521_v12  ;;  %1999 = vmatmul.msk.bf16.vlgmr.msrb.gmra.mxu3 %vm330_vm0, %v521_v12  ;;  %v434_v19 = vsel %vm433_vm7, %v2565_v37, %v432_v50  ;;  %vm1605_vm7 = vcmask 105472  }
  0xf1   : > { %v437_v0 = vsel %vm435_vm8, %v436_v21, %v434_v19  ;;  %vm1608_vm8 = vcmask 113664  }
  0xf2   : > { %v523_v31 = vpack.c.bf16 %v2551_v32, %v437_v0 }
  0xf9   : > { %730 = vadd.xlane.f32.xlu2 %v729_v14 }
 0x101   : > { %788 = vadd.xlane.f32.xlu2 %v787_v20 }
 0x106   : > { %718 = vadd.xlane.f32.xlu0 %v717_v26  ;;  %v481_v26 = vsel %vm330_vm0, %v437_v0, 0.0 }
 0x109   : > { %802 = vadd.xlane.f32.xlu2 %v801_v27 }
 0x117   : > { %485 = vadd.xlane.f32.xlu1 %v484_v33 }
 0x11a   : > { %751 = vrot.lane.b32.xlu0 %v2469_v42, %s2298_s18 }
 0x11f   : > { %v2597_v1 = vpop.permute.xlu2 %491 }
 0x120   : > { %v809_v4 = vmul.f32 %v2597_v1, %v2440_v9  ;;  %v497_v13 = vsel %vm330_vm0, %v2597_v1, 0.0 }
 0x121   : > { %509 = vrot.lane.b32.xlu2 %v2498_v63, %s2298_s18 }
 0x122   : > { %841 = vrot.lane.b32.xlu0 %v2483_v48, %s2298_s18 }
 0x12a   : > { %v840_v25 = vpop.permute.xlu2 %839 }
 0x12b   : > { %v845_v50 = vsel %vm330_vm0, %v840_v25, 0.0 }
 0x136   : > { %v2587_v55 = vpop.permute.xlu0 %739 }
 0x137   : > { %v745_v14 = vmul.f32 %v2587_v55, %v2440_v9  ;;  %v767_v53 = vmul.f32 %v2587_v55, %v2450_v35 }
 0x13e   : > { %v2568_v39 = vpop.permute.xlu1 %507  ;;  %v750_v2 = vpop.permute.xlu0 %749 }
 0x13f   : > { %v513_v41 = vsel %vm330_vm0, %v2568_v39, 0.0  ;;  %v811_v48 = vmul.f32 %v2568_v39, %v2450_v35  ;;  %v755_v12 = vmul.f32 %v750_v2, %v2450_v35  ;;  %v769_v34 = vmul.f32 %v750_v2, %v2440_v9 }
 0x140   : > { %514 = vadd.xlane.f32.xlu1 %v513_v41  ;;  %v825_v2 = vmul.f32 %v2568_v39, %v2440_v9 }
 0x141   : > { %v813_v7 = vadd.f32 %v811_v48, %v809_v4  ;;  %v757_v16 = vadd.f32 %v755_v12, %v745_v14 }
 0x143   : > { %v759_v23 = vsel %vm330_vm0, %v757_v16, 0.0  ;;  %v815_v4 = vsel %vm330_vm0, %v813_v7, 0.0 }
 0x146   : > { %v2579_v51 = vpop.permute.xlu1 %741  ;;  %v2617_v17 = vpop.permute.xlu0 %493 }
 0x147   : > { %v500_v44 = vsel %vm330_vm0, %v2617_v17, 0.0  ;;  %v768_v14 = vmul.f32 %v2579_v51, %v2469_v42 }
 0x14a   : > { %791 = vadd.xlane.f32.xlu2 %v790_v52 }
 0x14c   : > { %721 = vadd.xlane.f32.xlu0 %v720_v57 }
 0x14e   : > { %v2593_v60 = vpop.permute.xlu1 %857  ;;  %v856_v27 = vpop.permute.xlu0 %855 }
 0x14f   : > { %v861_v28 = vsel %vm330_vm0, %v856_v27, 0.0  ;;  %v864_v21 = vsel %vm330_vm0, %v2593_v60, 0.0 }
 0x152   : > { %805 = vadd.xlane.f32.xlu2 %v804_v61  ;;  %v771_v61 = vsub.f32 %v767_v53, %v769_v34 }
 0x154   : > { %733 = vadd.xlane.f32.xlu0 %v732_v3  ;;  %v773_v62 = vsel %vm330_vm0, %v771_v61, 0.0  ;;  %v823_v3 = vmul.f32 %v2597_v1, %v2450_v35 }
 0x156   : > { %v827_v48 = vsub.f32 %v823_v3, %v825_v2 }
 0x157   : > { %v2605_v6 = vpop.permute.xlu1 %467 }
 0x158   : > { %v829_v5 = vsel %vm330_vm0, %v827_v48, 0.0 }
 0x159   : > { %871 = vrot.lane.b32.xlu1 %v813_v7, %s2298_s18 }
 0x15a   : > { %498 = vadd.xlane.f32.xlu2 %v497_v13 }
 0x15c   : > { %451 = vadd.xlane.f32.xlu0 %v450_v15 }
 0x15f   : > { %v2620_v20 = vpop.permute.xlu1 %469 }
 0x160   : > { %v522_v22 = vpack.c.bf16 %v2620_v20, %v2605_v6  ;;  %v476_v2 = vsel %vm330_vm0, %v2620_v20, 0.0 }
 0x162   : > { %760 = vadd.xlane.f32.xlu2 %v759_v23  ;;  %1991 = vmatmul.msk.bf16.gmra.mxu0 %vm330_vm0, %v522_v22 }
 0x163   : > { %1994 = vmatmul.msk.bf16.gmra.mxu1 %vm330_vm0, %v522_v22  ;;  %1997 = vmatmul.msk.bf16.gmra.mxu2 %vm330_vm0, %v522_v22 }
 0x164   : > { %2000 = vmatmul.msk.bf16.gmra.mxu3 %vm330_vm0, %v522_v22  ;;  %482 = vadd.xlane.f32.xlu0 %v481_v26  ;;  %v810_v22 = vmul.f32 %v2617_v17, %v2462_v40  ;;  %v824_v26 = vmul.f32 %v2617_v17, %v2469_v42 }
 0x16a   : > { %862 = vadd.xlane.f32.xlu2 %v861_v28  ;;  %v746_v28 = vmul.f32 %v2579_v51, %v2462_v40 }
 0x16c   : > { %v2633_v29 = vpop.xlane.xlu2 %730  ;;  %454 = vadd.xlane.f32.xlu0 %v453_v30  ;;  %v638_v33 = vpop.f32.mrf.mxu0 }
 0x16d   : > { %3590 = vst [vmem:[#allocation12_spill] sm:$0xff] %v2633_v29  ;;  %v1013_v36 = vmul.f32 %v638_v33, %v2440_v9  ;;  %v2646_v11 = vmul.f32 %v638_v33, %v2450_v35  ;;  %v1221_v49 = vmul.f32 %v638_v33, %v638_v33 }
 0x172   : > { %1992 = vmatmul.msk.bf16.gmra.mxu0 %vm330_vm0, %v523_v31 }
 0x173   : > { %1995 = vmatmul.msk.bf16.gmra.mxu1 %vm330_vm0, %v523_v31  ;;  %v682_v41 = vpop.f32.mrf.mxu2  ;;  %1998 = vmatmul.msk.bf16.gmra.mxu2 %vm330_vm0, %v523_v31  ;;  %v2705_v34 = vpop.f32.mrf.mxu3 }
 0x174   : > { %v1015_v32 = vmul.f32 %v682_v41, %v2450_v35  ;;  %v2650_v45 = vmul.f32 %v682_v41, %v2440_v9  ;;  %v1223_v46 = vmul.f32 %v682_v41, %v682_v41  ;;  %2001 = vmatmul.msk.bf16.gmra.mxu3 %vm330_vm0, %v523_v31  ;;  %v2653_v52 = vpop.xlane.xlu2 %788  ;;  %501 = vadd.xlane.f32.xlu0 %v500_v44  ;;  %v2702_v31 = vpop.f32.mrf.mxu1 }
 0x175   : > { %v2661_v57 = vmul.f32 %v682_v41, %v638_v33  ;;  %v2708_v41 = vpop.f32.mrf.mxu0 }
 0x176   : > { %v2659_v56 = vadd.f32 %v1015_v32, %v1013_v36  ;;  %v2663_v59 = vadd.f32 %v1223_v46, %v1221_v49  ;;  %v473_v46 = vsel %vm330_vm0, %v2605_v6, 0.0 }
 0x178   : > { %3591 = vst [vmem:[#allocation13_spill] sm:$0xff] %v2663_v59 }
 0x179   : > { %v2674_v12 = vpop.xlane.xlu0 %718 }
 0x17b   : > { %v2714_v51 = vpop.f32.mrf.mxu2  ;;  %v2717_v53 = vpop.f32.mrf.mxu3 }
 0x17c   : > { %774 = vadd.xlane.f32.xlu0 %v773_v62  ;;  %v2670_v55 = vpop.xlane.xlu2 %802  ;;  %v2710_v44 = vpop.f32.mrf.mxu1 }
 0x17d   : > { %3592 = vst [vmem:[#allocation14_spill] sm:$0xff] %v2670_v55 }
 0x183   : > { %816 = vadd.xlane.f32.xlu1 %v815_v4 }
 0x184   : > { %830 = vadd.xlane.f32.xlu0 %v829_v5  ;;  %v2676_v13 = vpop.permute.xlu2 %509 }
 0x185   : > { %v516_v9 = vsel %vm330_vm0, %v2676_v13, 0.0  ;;  %v812_v19 = vmul.f32 %v2676_v13, %v2469_v42  ;;  %v826_v25 = vmul.f32 %v2676_v13, %v2462_v40 }
 0x187   : > { %v814_v23 = vadd.f32 %v812_v19, %v810_v22  ;;  %v828_v27 = vsub.f32 %v824_v26, %v826_v25 }
 0x189   : > { %v818_v0 = vsel %vm330_vm0, %v814_v23, 0.0  ;;  %v832_v36 = vsel %vm330_vm0, %v828_v27, 0.0 }
 0x18b   : > { %846 = vadd.xlane.f32.xlu1 %v845_v50 }
 0x18c   : > { %v752_v35 = vpop.permute.xlu0 %751  ;;  %517 = vadd.xlane.f32.xlu0 %v516_v9 }
 0x18d   : > { %v770_v7 = vmul.f32 %v752_v35, %v2462_v40  ;;  %v756_v60 = vmul.f32 %v752_v35, %v2469_v42 }
 0x18f   : > { %v772_v15 = vsub.f32 %v768_v14, %v770_v7  ;;  %v758_v30 = vadd.f32 %v756_v60, %v746_v28 }
 0x191   : > { %v776_v16 = vsel %vm330_vm0, %v772_v15, 0.0  ;;  %v762_v33 = vsel %vm330_vm0, %v758_v30, 0.0 }
 0x192   : > { %777 = vadd.xlane.f32.xlu2 %v776_v16 }
 0x194   : > { %865 = vadd.xlane.f32.xlu0 %v864_v21  ;;  %v842_v32 = vpop.permute.xlu0 %841 }
 0x195   : > { %v848_v49 = vsel %vm330_vm0, %v842_v32, 0.0 }
 0x19a   : > { %819 = vadd.xlane.f32.xlu2 %v818_v0 }
 0x1a4   : > { %873 = vrot.lane.b32.xlu1 %v814_v23, %s2298_s18 }
 0x1a8   : > { %887 = vrot.lane.b32.xlu0 %v827_v48, %s2298_s18 }
 0x1b2   : > { %889 = vrot.lane.b32.xlu2 %v828_v27, %s2298_s18 }
 0x1ce   : > { %763 = vadd.xlane.f32.xlu1 %v762_v33 }
 0x1d6   : > { %833 = vadd.xlane.f32.xlu1 %v832_v36 }
 0x1db   : > { %474 = vadd.xlane.f32.xlu2 %v473_v46 }
 0x1de   : > { %849 = vadd.xlane.f32.xlu1 %v848_v49 }
 0x1df   : > { %v643_v61 = vpop.f32.mrf.mxu0 }
 0x1e0   : > { %v2719_v62 = vpop.f32.mrf.mxu1 }
 0x1e1   : > { %v1117_v6 = vmul.f32 %v2719_v62, %v2442_v10  ;;  %v1289_v9 = vmul.f32 %v2719_v62, %v2702_v31  ;;  %v1303_v14 = vmul.f32 %v2705_v34, %v2719_v62  ;;  %v1425_v19 = vmul.f32 %v2719_v62, %v2719_v62 }
 0x1e3   : > { %477 = vadd.xlane.f32.xlu2 %v476_v2 }
 0x1e6   : > { %v687_v3 = vpop.f32.mrf.mxu2 }
 0x1e7   : > { %v2723_v48 = vpop.f32.mrf.mxu3  ;;  %v644_v4 = vpop.f32.mrf.mxu0 }
 0x1e8   : > { %v2727_v5 = vpop.f32.mrf.mxu1  ;;  %v1119_v50 = vmul.f32 %v2723_v48, %v2454_v38  ;;  %v1291_v35 = vmul.f32 %v2723_v48, %v2705_v34  ;;  %v1305_v20 = vmul.f32 %v2723_v48, %v2702_v31  ;;  %v1427_v21 = vmul.f32 %v2723_v48, %v2723_v48 }
 0x1e9   : > { %v2751_v22 = vmul.f32 %v2723_v48, %v2719_v62  ;;  %v1290_v60 = vmul.f32 %v2727_v5, %v2710_v44  ;;  %v1304_v30 = vmul.f32 %v2717_v53, %v2727_v5  ;;  %v1426_v46 = vmul.f32 %v2727_v5, %v2727_v5 }
 0x1ea   : > { %v2739_v7 = vadd.f32 %v1119_v50, %v1117_v6  ;;  %v2741_v15 = vadd.f32 %v1291_v35, %v1289_v9  ;;  %v2743_v16 = vsub.f32 %v1303_v14, %v1305_v20  ;;  %v2753_v23 = vadd.f32 %v1427_v21, %v1425_v19 }
 0x1eb   : > { %3595 = vst [vmem:[#allocation17_spill] sm:$0xff] %v2751_v22  ;;  %v2889_v22 = vpop.xlane.xlu0 %721 }
 0x1ec   : > { %3593 = vst [vmem:[#allocation15_spill] sm:$0xff] %v2741_v15 }
 0x1ed   : > { %3594 = vst [vmem:[#allocation16_spill] sm:$0xff] %v2743_v16 }
 0x1ee   : > { %3596 = vst [vmem:[#allocation18_spill] sm:$0xff] %v2753_v23  ;;  %v688_v0 = vpop.f32.mrf.mxu2 }
 0x1ef   : > { %v2755_v25 = vpop.f32.mrf.mxu3  ;;  %v646_v26 = vpop.f32.mrf.mxu0 }
 0x1f0   : > { %v2757_v27 = vpop.f32.mrf.mxu1  ;;  %v1292_v28 = vmul.f32 %v2755_v25, %v2717_v53  ;;  %v1306_v33 = vmul.f32 %v2755_v25, %v2710_v44  ;;  %v1428_v49 = vmul.f32 %v2755_v25, %v2755_v25  ;;  %v2777_v61 = vmul.f32 %v2755_v25, %v2727_v5 }
 0x1f1   : > { %v1483_v2 = vmul.f32 %v2757_v27, %v2719_v62  ;;  %v2785_v4 = vmul.f32 %v2723_v48, %v2757_v27  ;;  %v2793_v35 = vmul.f32 %v2757_v27, %v2454_v38  ;;  %v2801_v14 = vmul.f32 %v2705_v34, %v2757_v27 }
 0x1f2   : > { %v2767_v36 = vadd.f32 %v1292_v28, %v1290_v60  ;;  %v2769_v32 = vsub.f32 %v1304_v30, %v1306_v33  ;;  %3599 = vst [vmem:[#allocation21_spill] sm:$0xff] %v2777_v61  ;;  %v2781_v3 = vadd.f32 %v1428_v49, %v1426_v46  ;;  %v1527_v33 = vmul.f32 %v2757_v27, %v2757_v27  ;;  %v486_v61 = vpop.xlane.xlu1 %485 }
 0x1f3   : > { %3601 = vst [vmem:[#allocation23_spill] sm:$0xff] %v2785_v4 }
 0x1f4   : > { %3597 = vst [vmem:[#allocation19_spill] sm:$0xff] %v2767_v36 }
 0x1f5   : > { %3598 = vst [vmem:[#allocation20_spill] sm:$0xff] %v2769_v32 }
 0x1f6   : > { %3600 = vst [vmem:[#allocation22_spill] sm:$0xff] %v2781_v3  ;;  %v690_v6 = vpop.f32.mrf.mxu2 }
 0x1f7   : > { %v2787_v50 = vpop.f32.mrf.mxu3  ;;  %903 = vrot.lane.b32.xlu1 %v2532_v18, %s2298_s18  ;;  %v647_v9 = vpop.f32.mrf.mxu0  ;;  %3602 = vst [vmem:[#allocation24_spill] sm:$0xff] %v2801_v14  ;;  %v1381_v18 = vmul.f32 %v2757_v27, %v2702_v31 }
 0x1f8   : > { %v2797_v20 = vmul.f32 %v2787_v50, %v2442_v10  ;;  %v2805_v19 = vmul.f32 %v2787_v50, %v2702_v31  ;;  %v2807_v21 = vpop.f32.mrf.mxu1  ;;  %v1383_v0 = vmul.f32 %v2787_v50, %v2705_v34  ;;  %v1485_v30 = vmul.f32 %v2787_v50, %v2723_v48 }
 0x1f9   : > { %v1484_v46 = vmul.f32 %v2807_v21, %v2727_v5  ;;  %v1529_v49 = vmul.f32 %v2787_v50, %v2787_v50  ;;  %v2831_v6 = vmul.f32 %v2787_v50, %v2719_v62  ;;  %v2835_v9 = vmul.f32 %v2755_v25, %v2807_v21 }
 0x1fa   : > { %3603 = vst [vmem:[#allocation25_spill] sm:$0xff] %v2805_v19  ;;  %v2817_v28 = vadd.f32 %v1383_v0, %v1381_v18  ;;  %v2837_v18 = vadd.f32 %v1485_v30, %v1483_v2  ;;  %v2841_v0 = vmul.f32 %v2787_v50, %v2757_v27  ;;  %v1382_v55 = vmul.f32 %v2807_v21, %v2710_v44 }
 0x1fb   : > { %919 = vrot.lane.b32.xlu2 %v2540_v24, %s2298_s18  ;;  %3605 = vst [vmem:[#allocation27_spill] sm:$0xff] %v2831_v6  ;;  %v2843_v60 = vadd.f32 %v1529_v49, %v1527_v33  ;;  %v2857_v30 = vmul.f32 %v2717_v53, %v2807_v21  ;;  %v1528_v33 = vmul.f32 %v2807_v21, %v2807_v21 }
 0x1fc   : > { %3604 = vst [vmem:[#allocation26_spill] sm:$0xff] %v2817_v28 }
 0x1fd   : > { %3606 = vst [vmem:[#allocation28_spill] sm:$0xff] %v2835_v9 }
 0x1fe   : > { %3607 = vst [vmem:[#allocation29_spill] sm:$0xff] %v2837_v18  ;;  %v691_v24 = vpop.f32.mrf.mxu2 }
 0x1ff   : > { %3608 = vst [vmem:[#allocation30_spill] sm:$0xff] %v2841_v0  ;;  %v2847_v54 = vpop.f32.mrf.mxu3  ;;  %905 = vrot.lane.b32.xlu1 %v2576_v47, %s2298_s18  ;;  %v2875_v0 = vpop.xlane.xlu2 %791 }
 0x200   : > { %3609 = vst [vmem:[#allocation31_spill] sm:$0xff] %v2843_v60  ;;  %v1384_v2 = vmul.f32 %v2847_v54, %v2717_v53  ;;  %v2863_v49 = vmul.f32 %v2847_v54, %v2710_v44  ;;  %v1530_v47 = vmul.f32 %v2847_v54, %v2847_v54  ;;  %v2869_v24 = vmul.f32 %v2847_v54, %v2807_v21 }
 0x201   : > { %3610 = vst [vmem:[#allocation32_spill] sm:$0xff] %v2857_v30  ;;  %v1486_v26 = vmul.f32 %v2847_v54, %v2755_v25  ;;  %v2885_v18 = vmul.f32 %v2847_v54, %v2727_v5 }
 0x202   : > { %3611 = vst [vmem:[#allocation33_spill] sm:$0xff] %v2863_v49  ;;  %v2873_v29 = vadd.f32 %v1384_v2, %v1382_v55  ;;  %v2879_v4 = vadd.f32 %v1530_v47, %v1528_v33  ;;  %v2893_v2 = vpop.xlane.xlu0 %733  ;;  %v515_v47 = vpop.xlane.xlu1 %514 }
 0x203   : > { %3612 = vst [vmem:[#allocation34_spill] sm:$0xff] %v2869_v24  ;;  %v2881_v60 = vadd.f32 %v1486_v26, %v1484_v46  ;;  %v2299_v24 = vmov 64.0  }
 0x204   : > { %3613 = vst [vmem:[#allocation35_spill] sm:$0xff] %v2873_v29  ;;  %2128 = vrcp.f32 %v2299_v24 }
 0x205   : > { %3614 = vst [vmem:[#allocation36_spill] sm:$0xff] %v2879_v4 }
 0x206   : > { %3615 = vst [vmem:[#allocation37_spill] sm:$0xff] %v2881_v60 }
 0x207   : > { %3616 = vst [vmem:[#allocation38_spill] sm:$0xff] %v2885_v18  ;;  %v2891_v55 = vpop.xlane.xlu2 %805 }
 0x208   : > { %3617 = vst [vmem:[#allocation39_spill] sm:$0xff] %v2891_v55 }
 0x209   : > { %3618 = vst [vmem:[#allocation40_spill] sm:$0xff] %v2893_v2 }
 0x20a   : > { %v452_v6 = vpop.xlane.xlu0 %451  ;;  %v2895_v46 = vpop.permute.xlu1 %871 }
 0x20b   : > { %v2129_v18 = vpop.eup %2128 }
 0x20c   : > { %v457_v3 = vmul.f32 64.0, %v2129_v18  ;;  %vm461_vm9 = vweird.f32 %v2129_v18 }
 0x20e   : > { %v458_v29 = vsub.f32 1.0, %v457_v3 }
 0x20f   : > { %v499_v23 = vpop.xlane.xlu2 %498 }
 0x210   : > { %v459_v19 = vmul.f32 %v2129_v18, %v458_v29 }
 0x212   : > { %v483_v26 = vpop.xlane.xlu0 %482  ;;  %v817_v4 = vpop.xlane.xlu1 %816 }
 0x217   : > { %v761_v33 = vpop.xlane.xlu2 %760 }
 0x21a   : > { %v455_v49 = vpop.xlane.xlu0 %454  ;;  %v847_v55 = vpop.xlane.xlu1 %846 }
 0x21f   : > { %v2897_v60 = vpop.xlane.xlu2 %862 }
 0x220   : > { %3619 = vst [vmem:[#allocation41_spill] sm:$0xff] %v2897_v60  ;;  %v460_v60 = vadd.f32 %v2129_v18, %v459_v19 }
 0x222   : > { %v502_v9 = vpop.xlane.xlu0 %501  ;;  %v2903_v28 = vpop.permute.xlu1 %873 }
 0x227   : > { %v2899_v30 = vpop.xlane.xlu2 %777 }
 0x228   : > { %3620 = vst [vmem:[#allocation42_spill] sm:$0xff] %v2899_v30  ;;  %v2909_v30 = vsel %vm461_vm9, %v2129_v18, %v460_v60  ;;  %vm1611_vm9 = vcmask 121856  }
 0x229   : > { %v463_v32 = vmul.f32 %v2909_v30, %v452_v6  ;;  %v487_v3 = vmul.f32 %v483_v26, %v2909_v30  ;;  %v503_v29 = vmul.f32 %v499_v23, %v2909_v30  ;;  %v793_v26 = vmul.f32 %v2653_v52, %v2909_v30 }
 0x22a   : > { %v2905_v14 = vpop.xlane.xlu0 %774 }
 0x22f   : > { %v2901_v2 = vpop.xlane.xlu2 %819 }
 0x232   : > { %v2914_v59 = vpop.xlane.xlu0 %830 }
 0x233   : > { %3621 = vst [vmem:[#allocation43_spill] sm:$0xff] %v2914_v59 }
 0x237   : > { %v2907_v16 = vpop.permute.xlu2 %889 }
 0x241   : > { %v764_v15 = vpop.xlane.xlu1 %763 }
 0x249   : > { %v2924_v59 = vpop.xlane.xlu1 %833 }
 0x24e   : > { %v475_v24 = vpop.xlane.xlu2 %474 }
 0x24f   : > { %v479_v36 = vmul.f32 %v475_v24, %v2909_v30  ;;  %v519_v24 = vmul.f32 %v515_v47, %v2909_v30 }
 0x251   : > { %v1570_v19 = vsel %vm1569_vm10, %v463_v32, %v479_v36  ;;  %v723_v36 = vmul.f32 %v2674_v12, %v2909_v30  ;;  %v765_v32 = vmul.f32 %v761_v33, %v2909_v30  ;;  %v821_v12 = vmul.f32 %v817_v4, %v2909_v30 }
 0x252   : > { %v1573_v60 = vsel %vm1572_vm11, %v1570_v19, %v487_v3  ;;  %v464_v19 = vmul.f32 %v2909_v30, %v455_v49  ;;  %v851_v49 = vmul.f32 %v847_v55, %v2909_v30  ;;  %v724_v55 = vmul.f32 %v2889_v22, %v2909_v30 }
 0x253   : > { %v1576_v18 = vsel %vm1575_vm12, %v1573_v60, %v503_v29  ;;  %v488_v60 = vmul.f32 %v486_v61, %v2909_v30 }
 0x254   : > { %v1579_v6 = vsel %vm1578_vm13, %v1576_v18, 0.0  ;;  %v504_v18 = vmul.f32 %v502_v9, %v2909_v30 }
 0x255   : > { %v1582_v23 = vsel %vm1581_vm14, %v1579_v6, 0.0 }
 0x256   : > { %v1585_v3 = vsel %vm1584_vm15, %v1582_v23, 0.0  ;;  %v478_v29 = vpop.xlane.xlu2 %477 }
 0x257   : > { %v1588_v52 = vsel %vm1587_vm1, %v1585_v3, %v519_v24  ;;  %v480_v47 = vmul.f32 %v478_v29, %v2909_v30  ;;  %v518_v24 = vpop.xlane.xlu0 %517 }
 0x258   : > { %v1591_v6 = vsel %vm1590_vm2, %v1588_v52, %v723_v36 }
 0x259   : > { %v1571_v33 = vsel %vm1569_vm10, %v464_v19, %v480_v47  ;;  %v1594_v23 = vsel %vm1593_vm3, %v1591_v6, %v765_v32  ;;  %v520_v19 = vmul.f32 %v518_v24, %v2909_v30  ;;  %v850_v47 = vpop.xlane.xlu1 %849 }
 0x25a   : > { %v1574_v3 = vsel %vm1572_vm11, %v1571_v33, %v488_v60  ;;  %v1597_v29 = vsel %vm1596_vm4, %v1594_v23, %v793_v26  ;;  %v766_v26 = vmul.f32 %v764_v15, %v2909_v30  ;;  %v852_v23 = vmul.f32 %v850_v47, %v2909_v30 }
 0x25b   : > { %v1577_v61 = vsel %vm1575_vm12, %v1574_v3, %v504_v18  ;;  %v1600_v9 = vsel %vm1599_vm5, %v1597_v29, %v821_v12  ;;  %v794_v18 = vmul.f32 %v2875_v0, %v2909_v30  ;;  %v822_v12 = vmul.f32 %v2901_v2, %v2909_v30 }
 0x25c   : > { %v1580_v36 = vsel %vm1578_vm13, %v1577_v61, 0.0  ;;  %v2947_v4 = vsel %vm1602_vm6, %v1600_v9, %v851_v49  ;;  %v877_v2 = vsel %vm330_vm0, %v2895_v46, 0.0  ;;  %v933_v61 = vsel %vm330_vm0, %v2565_v37, 0.0 }
 0x25d   : > { %v1583_v32 = vsel %vm1581_vm14, %v1580_v36, 0.0  ;;  %v936_v9 = vsel %vm330_vm0, %v2513_v8, 0.0  ;;  %v941_v36 = vmul.f32 %v2454_v38, %v2442_v10 }
 0x25e   : > { %v1586_v52 = vsel %vm1584_vm15, %v1583_v32, 0.0  ;;  %v956_v32 = vmul.f32 %v2676_v13, %v2498_v63 }
 0x25f   : > { %v1589_v60 = vsel %vm1587_vm1, %v1586_v52, %v520_v19  ;;  %v2980_v19 = vsub.f32 %v941_v36, %v941_v36 }
 0x260   : > { %v1592_v6 = vsel %vm1590_vm2, %v1589_v60, %v724_v55 }
 0x261   : > { %v1595_v33 = vsel %vm1593_vm3, %v1592_v6, %v766_v26  ;;  %v945_v46 = vsel %vm330_vm0, %v2980_v19, 0.0  ;;  %v2989_v26 = vpop.xlane.xlu0 %865 }
 0x262   : > { %v1598_v22 = vsel %vm1596_vm4, %v1595_v33, %v794_v18  ;;  %v920_v18 = vpop.permute.xlu2 %919  ;;  %v953_v33 = vmul.f32 %v2597_v1, %v2442_v10 }
 0x263   : > { %v1601_v49 = vsel %vm1599_vm5, %v1598_v22, %v822_v12  ;;  %v925_v6 = vsel %vm330_vm0, %v920_v18, 0.0  ;;  %v955_v12 = vmul.f32 %v2568_v39, %v2454_v38  ;;  %v942_v22 = vmul.f32 %v2498_v63, %v2471_v43 }
 0x264   : > { %v2966_v15 = vsel %vm1602_vm6, %v1601_v49, %v852_v23 }
 0x265   : > { %v957_v23 = vadd.f32 %v955_v12, %v953_v33  ;;  %v969_v12 = vmul.f32 %v2568_v39, %v2442_v10  ;;  %v967_v33 = vmul.f32 %v2597_v1, %v2454_v38  ;;  %v3622_v1 = vsub.f32 %v2646_v11, %v2650_v45 }
 0x267   : > { %v959_v49 = vsel %vm330_vm0, %v957_v23, 0.0  ;;  %v971_v23 = vsub.f32 %v967_v33, %v969_v12 }
 0x269   : > { %v904_v24 = vpop.permute.xlu1 %903  ;;  %v888_v47 = vpop.permute.xlu0 %887 }
 0x26a   : > { %v909_v3 = vsel %vm330_vm0, %v904_v24, 0.0  ;;  %v893_v60 = vsel %vm330_vm0, %v888_v47, 0.0  ;;  %v970_v24 = vmul.f32 %v2676_v13, %v2471_v43 }
 0x26b   : > { %910 = vadd.xlane.f32.xlu0 %v909_v3  ;;  %v944_v3 = vsub.f32 %v942_v22, %v942_v22  ;;  %v973_v22 = vsel %vm330_vm0, %v971_v23, 0.0 }
 0x271   : > { %v906_v0 = vpop.permute.xlu1 %905 }
 0x272   : > { %v912_v29 = vsel %vm330_vm0, %v906_v0, 0.0  ;;  %v968_v0 = vmul.f32 %v2617_v17, %v2498_v63 }
 0x273   : > { %913 = vadd.xlane.f32.xlu1 %v912_v29 }
 0x274   : > { %v972_v29 = vsub.f32 %v968_v0, %v970_v24 }
 0x27b   : > { %878 = vadd.xlane.f32.xlu1 %v877_v2  ;;  %v976_v2 = vsel %vm330_vm0, %v972_v29, 0.0 }
 0x27f   : > { %921 = vrot.lane.b32.xlu0 %v2591_v58, %s2298_s18  ;;  %v954_v58 = vmul.f32 %v2617_v17, %v2471_v43 }
 0x281   : > { %v958_v55 = vadd.f32 %v956_v32, %v954_v58 }
 0x283   : > { %934 = vadd.xlane.f32.xlu1 %v933_v61  ;;  %v962_v52 = vsel %vm330_vm0, %v958_v55, 0.0 }
 0x28b   : > { %937 = vadd.xlane.f32.xlu1 %v936_v9 }
 0x293   : > { %946 = vadd.xlane.f32.xlu1 %v945_v46 }
 0x29b   : > { %963 = vadd.xlane.f32.xlu1 %v962_v52 }
 0x2a9   : > { %894 = vadd.xlane.f32.xlu0 %v893_v60  ;;  %v880_v60 = vsel %vm330_vm0, %v2903_v28, 0.0 }
 0x2b1   : > { %926 = vadd.xlane.f32.xlu0 %v925_v6  ;;  %v948_v6 = vsel %vm330_vm0, %v944_v3, 0.0 }
 0x2b4   : > { %983 = vrot.lane.b32.xlu1 %v2565_v37, %s2298_s18 }
 0x2b9   : > { %960 = vadd.xlane.f32.xlu0 %v959_v49 }
 0x2bc   : > { %1001 = vrot.lane.b32.xlu1 %v944_v3, %s2298_s18 }
 0x2c1   : > { %977 = vadd.xlane.f32.xlu0 %v976_v2 }
 0x2de   : > { %v911_v61 = vpop.xlane.xlu0 %910 }
 0x2df   : > { %v915_v17 = vmul.f32 %v911_v61, %v2909_v30 }
 0x2e6   : > { %v914_v37 = vpop.xlane.xlu1 %913 }
 0x2e7   : > { %v916_v61 = vmul.f32 %v914_v37, %v2909_v30  ;;  %v1014_v37 = vmul.f32 %v2708_v41, %v2462_v40 }
 0x2ee   : > { %v879_v9 = vpop.xlane.xlu1 %878 }
 0x2ef   : > { %v883_v36 = vmul.f32 %v879_v9, %v2909_v30 }
 0x2f1   : > { %v1606_v13 = vsel %vm1605_vm7, %v2947_v4, %v883_v36  ;;  %v922_v46 = vpop.permute.xlu0 %921  ;;  %v896_v4 = vsel %vm330_vm0, %v2907_v16, 0.0 }
 0x2f2   : > { %v928_v32 = vsel %vm330_vm0, %v922_v46, 0.0  ;;  %v1609_v52 = vsel %vm1608_vm8, %v1606_v13, %v915_v17 }
 0x2f3   : > { %929 = vadd.xlane.f32.xlu2 %v928_v32 }
 0x2f6   : > { %v935_v58 = vpop.xlane.xlu1 %934 }
 0x2f7   : > { %v939_v55 = vmul.f32 %v935_v58, %v2909_v30 }
 0x2f9   : > { %v3016_v47 = vsel %vm1611_vm9, %v1609_v52, %v939_v55 }
 0x2fb   : > { %881 = vadd.xlane.f32.xlu2 %v880_v60 }
 0x2fe   : > { %v938_v18 = vpop.xlane.xlu1 %937 }
 0x2ff   : > { %v940_v9 = vmul.f32 %v938_v18, %v2909_v30 }
 0x303   : > { %897 = vadd.xlane.f32.xlu2 %v896_v4 }
 0x306   : > { %v3028_v28 = vpop.xlane.xlu1 %946 }
 0x30b   : > { %949 = vadd.xlane.f32.xlu2 %v948_v6 }
 0x30e   : > { %v964_v49 = vpop.xlane.xlu1 %963 }
 0x313   : > { %974 = vadd.xlane.f32.xlu2 %v973_v22 }
 0x31c   : > { %v3072_v18 = vpop.xlane.xlu0 %894 }
 0x324   : > { %v3075_v6 = vpop.xlane.xlu0 %926 }
 0x326   : > { %v984_v24 = vpop.permute.xlu1 %983 }
 0x327   : > { %v989_v16 = vsel %vm330_vm0, %v984_v24, 0.0  ;;  %v966_v24 = vmul.f32 %v964_v49, %v2909_v30  ;;  %v1036_v49 = vmul.f32 %v2708_v41, %v2469_v42 }
 0x328   : > { %990 = vadd.xlane.f32.xlu0 %v989_v16 }
 0x32b   : > { %985 = vrot.lane.b32.xlu2 %v2513_v8, %s2298_s18 }
 0x32c   : > { %v3077_v12 = vpop.xlane.xlu0 %960 }
 0x32e   : > { %v1002_v3 = vpop.permute.xlu1 %1001 }
 0x32f   : > { %v1008_v39 = vsel %vm330_vm0, %v1002_v3, 0.0 }
 0x330   : > { %1009 = vadd.xlane.f32.xlu1 %v1008_v39 }
 0x334   : > { %v3079_v33 = vpop.xlane.xlu0 %977 }
 0x349   : > { %1043 = vrot.lane.b32.xlu1 %v3622_v1, %s2298_s18 }
 0x366   : > { %v3038_v0 = vpop.xlane.xlu2 %929 }
 0x36e   : > { %v882_v29 = vpop.xlane.xlu2 %881 }
 0x36f   : > { %v884_v2 = vmul.f32 %v882_v29, %v2909_v30 }
 0x371   : > { %v1607_v8 = vsel %vm1605_vm7, %v2966_v15, %v884_v2  ;;  %v1016_v15 = vmul.f32 %v2714_v51, %v2469_v42 }
 0x372   : > { %v1610_v36 = vsel %vm1608_vm8, %v1607_v8, %v916_v61  ;;  %v1038_v8 = vmul.f32 %v2714_v51, %v2462_v40 }
 0x373   : > { %v3047_v13 = vsel %vm1611_vm9, %v1610_v36, %v940_v9  ;;  %v1018_v58 = vadd.f32 %v1016_v15, %v1014_v37 }
 0x374   : > { %v1040_v36 = vsub.f32 %v1036_v49, %v1038_v8 }
 0x376   : > { %v3049_v46 = vpop.xlane.xlu2 %897 }
 0x37e   : > { %v3051_v11 = vpop.xlane.xlu2 %949 }
 0x386   : > { %v3053_v45 = vpop.xlane.xlu2 %974 }
 0x38e   : > { %v986_v32 = vpop.permute.xlu2 %985 }
 0x38f   : > { %v992_v17 = vsel %vm330_vm0, %v986_v32, 0.0  ;;  %v1059_v32 = vmul.f32 %v2705_v34, %v2454_v38 }
 0x390   : > { %993 = vadd.xlane.f32.xlu0 %v992_v17  ;;  %v1057_v17 = vmul.f32 %v2702_v31, %v2442_v10 }
 0x392   : > { %v1061_v15 = vadd.f32 %v1059_v32, %v1057_v17 }
 0x394   : > { %v1063_v37 = vsel %vm330_vm0, %v1061_v15, 0.0 }
 0x39b   : > { %v3081_v23 = vpop.xlane.xlu0 %990 }
 0x3a3   : > { %v3064_v55 = vpop.xlane.xlu1 %1009 }
 0x3a4   : > { %999 = vrot.lane.b32.xlu0 %v2980_v19, %s2298_s18  ;;  %v1060_v19 = vmul.f32 %v2717_v53, %v2498_v63 }
 0x3ac   : > { %1021 = vrot.lane.b32.xlu0 %v2659_v56, %s2298_s18  ;;  %v1058_v56 = vmul.f32 %v2710_v44, %v2471_v43 }
 0x3ae   : > { %v1062_v4 = vadd.f32 %v1060_v19, %v1058_v56 }
 0x3b0   : > { %v1066_v56 = vsel %vm330_vm0, %v1062_v4, 0.0 }
 0x3b4   : > { %1023 = vrot.lane.b32.xlu0 %v1018_v58, %s2298_s18 }
 0x3bb   : > { %v1044_v52 = vpop.permute.xlu1 %1043 }
 0x3bc   : > { %v1049_v60 = vsel %vm330_vm0, %v1044_v52, 0.0 }
 0x3bd   : > { %1050 = vadd.xlane.f32.xlu1 %v1049_v60 }
 0x3d6   : > { %1089 = vrot.lane.b32.xlu1 %v1062_v4, %s2298_s18 }
 0x403   : > { %v994_v22 = vpop.xlane.xlu0 %993 }
 0x404   : > { %v996_v16 = vmul.f32 %v994_v22, %v2909_v30  ;;  %v1073_v22 = vmul.f32 %v2705_v34, %v2442_v10 }
 0x406   : > { %v1615_v3 = vsel %vm1569_vm10, %v966_v24, %v996_v16  ;;  %v1071_v24 = vmul.f32 %v2702_v31, %v2454_v38 }
 0x408   : > { %v1075_v16 = vsub.f32 %v1071_v24, %v1073_v22 }
 0x416   : > { %v1000_v39 = vpop.permute.xlu0 %999 }
 0x417   : > { %v1005_v1 = vsel %vm330_vm0, %v1000_v39, 0.0  ;;  %v1077_v39 = vsel %vm330_vm0, %v1075_v16, 0.0 }
 0x418   : > { %1006 = vadd.xlane.f32.xlu2 %v1005_v1  ;;  %v1074_v1 = vmul.f32 %v2717_v53, %v2471_v43 }
 0x41e   : > { %v1022_v29 = vpop.permute.xlu0 %1021 }
 0x41f   : > { %v1027_v2 = vsel %vm330_vm0, %v1022_v29, 0.0 }
 0x420   : > { %1028 = vadd.xlane.f32.xlu0 %v1027_v2 }
 0x426   : > { %v1024_v61 = vpop.permute.xlu0 %1023 }
 0x427   : > { %v1030_v9 = vsel %vm330_vm0, %v1024_v61, 0.0 }
 0x428   : > { %1031 = vadd.xlane.f32.xlu2 %v1030_v9 }
 0x430   : > { %v3125_v17 = vpop.xlane.xlu1 %1050 }
 0x440   : > { %1045 = vrot.lane.b32.xlu2 %v1040_v36, %s2298_s18 }
 0x469   : > { %1064 = vadd.xlane.f32.xlu2 %v1063_v37 }
 0x48b   : > { %v3099_v58 = vpop.xlane.xlu2 %1006 }
 0x493   : > { %v1029_v2 = vpop.xlane.xlu0 %1028 }
 0x49b   : > { %v1032_v52 = vpop.xlane.xlu2 %1031 }
 0x49c   : > { %v1034_v40 = vmul.f32 %v1032_v52, %v2909_v30 }
 0x49e   : > { %v1617_v42 = vsel %vm1572_vm11, %v1615_v3, %v1034_v40  ;;  %v1072_v3 = vmul.f32 %v2710_v44, %v2498_v63 }
 0x4a0   : > { %v1076_v29 = vsub.f32 %v1072_v3, %v1074_v1 }
 0x4a2   : > { %v1080_v4 = vsel %vm330_vm0, %v1076_v29, 0.0 }
 0x4a3   : > { %v1046_v60 = vpop.permute.xlu2 %1045 }
 0x4a4   : > { %v1052_v19 = vsel %vm330_vm0, %v1046_v60, 0.0 }
 0x4a5   : > { %1053 = vadd.xlane.f32.xlu0 %v1052_v19 }
 0x4ad   : > { %1067 = vadd.xlane.f32.xlu0 %v1066_v56  ;;  %v1120_v56 = vmul.f32 %v2755_v25, %v2498_v63 }
 0x4b5   : > { %1078 = vadd.xlane.f32.xlu0 %v1077_v39  ;;  %v1132_v39 = vmul.f32 %v2727_v5, %v2498_v63 }
 0x4bd   : > { %1081 = vadd.xlane.f32.xlu0 %v1080_v4  ;;  %v1133_v4 = vmul.f32 %v2723_v48, %v2442_v10 }
 0x4d1   : > { %1087 = vrot.lane.b32.xlu0 %v1061_v15, %s2298_s18  ;;  %v1090_v15 = vpop.permute.xlu1 %1089 }
 0x4d2   : > { %v1096_v60 = vsel %vm330_vm0, %v1090_v15, 0.0 }
 0x4d9   : > { %1103 = vrot.lane.b32.xlu0 %v1075_v16, %s2298_s18  ;;  %v1134_v16 = vmul.f32 %v2755_v25, %v2471_v43 }
 0x4db   : > { %v1136_v1 = vsub.f32 %v1132_v39, %v1134_v16 }
 0x4dc   : > { %v1065_v25 = vpop.xlane.xlu2 %1064 }
 0x4dd   : > { %v1140_v3 = vsel %vm330_vm0, %v1136_v1, 0.0  ;;  %v1069_v48 = vmul.f32 %v1065_v25, %v2909_v30 }
 0x518   : > { %v3117_v61 = vpop.xlane.xlu0 %1053 }
 0x520   : > { %v1068_v9 = vpop.xlane.xlu0 %1067 }
 0x521   : > { %v1070_v8 = vmul.f32 %v1068_v9, %v2909_v30  ;;  %v1131_v9 = vmul.f32 %v2719_v62, %v2454_v38 }
 0x523   : > { %v1619_v49 = vsel %vm1575_vm12, %v1617_v42, %v1070_v8  ;;  %v1118_v42 = vmul.f32 %v2727_v5, %v2471_v43  ;;  %v1135_v8 = vsub.f32 %v1131_v9, %v1133_v4  ;;  %v1123_v5 = vsel %vm330_vm0, %v2739_v7, 0.0 }
 0x524   : > { %v1177_v9 = vmul.f32 %v2757_v27, %v2442_v10 }
 0x525   : > { %v1122_v22 = vadd.f32 %v1120_v56, %v1118_v42  ;;  %v1137_v4 = vsel %vm330_vm0, %v1135_v8, 0.0 }
 0x527   : > { %v1126_v24 = vsel %vm330_vm0, %v1122_v22, 0.0 }
 0x528   : > { %v3121_v36 = vpop.xlane.xlu0 %1078 }
 0x530   : > { %v3123_v32 = vpop.xlane.xlu0 %1081 }
 0x543   : > { %v1088_v37 = vpop.permute.xlu0 %1087 }
 0x544   : > { %v1093_v52 = vsel %vm330_vm0, %v1088_v37, 0.0  ;;  %v995_v37 = vmul.f32 %v3081_v23, %v2909_v30 }
 0x545   : > { %1094 = vadd.xlane.f32.xlu2 %v1093_v52  ;;  %v965_v52 = vmul.f32 %v3077_v12, %v2909_v30 }
 0x547   : > { %v1614_v62 = vsel %vm1569_vm10, %v965_v52, %v995_v37 }
 0x54b   : > { %v1104_v40 = vpop.permute.xlu0 %1103 }
 0x54c   : > { %v1109_v19 = vsel %vm330_vm0, %v1104_v40, 0.0 }
 0x54d   : > { %1097 = vadd.xlane.f32.xlu2 %v1096_v60  ;;  %1110 = vadd.xlane.f32.xlu0 %v1109_v19 }
 0x555   : > { %1127 = vadd.xlane.f32.xlu0 %v1126_v24 }
 0x55d   : > { %1141 = vadd.xlane.f32.xlu0 %v1140_v3 }
 0x565   : > { %1105 = vrot.lane.b32.xlu2 %v1076_v29, %s2298_s18  ;;  %v1033_v29 = vmul.f32 %v1029_v2, %v2909_v30 }
 0x567   : > { %v1616_v40 = vsel %vm1572_vm11, %v1614_v62, %v1033_v29 }
 0x568   : > { %v1618_v19 = vsel %vm1575_vm12, %v1616_v40, %v1069_v48  ;;  %v1180_v40 = vmul.f32 %v2847_v54, %v2498_v63 }
 0x571   : > { %1149 = vrot.lane.b32.xlu0 %v1122_v22, %s2298_s18 }
 0x579   : > { %1163 = vrot.lane.b32.xlu0 %v1135_v8, %s2298_s18 }
 0x58e   : > { %1124 = vadd.xlane.f32.xlu2 %v1123_v5 }
 0x5b8   : > { %v1095_v15 = vpop.xlane.xlu2 %1094 }
 0x5b9   : > { %v1099_v60 = vmul.f32 %v1095_v15, %v2909_v30  ;;  %v3623_v15 = vsub.f32 %v2793_v35, %v2797_v20  ;;  %v1224_v35 = vmul.f32 %v2714_v51, %v2714_v51  ;;  %v1222_v20 = vmul.f32 %v2708_v41, %v2708_v41 }
 0x5bb   : > { %v1620_v56 = vsel %vm1578_vm13, %v1618_v19, %v1099_v60  ;;  %v1202_v60 = vmul.f32 %v2847_v54, %v2471_v43  ;;  %v1178_v19 = vmul.f32 %v2807_v21, %v2471_v43 }
 0x5c0   : > { %v1098_v42 = vpop.xlane.xlu2 %1097  ;;  %v3160_v23 = vpop.xlane.xlu0 %1110 }
 0x5c1   : > { %v1100_v2 = vmul.f32 %v1098_v42, %v2909_v30  ;;  %v1200_v42 = vmul.f32 %v2807_v21, %v2498_v63 }
 0x5c3   : > { %v1621_v12 = vsel %vm1578_vm13, %v1619_v49, %v1100_v2  ;;  %v1179_v49 = vmul.f32 %v2787_v50, %v2454_v38  ;;  %v1182_v2 = vadd.f32 %v1180_v40, %v1178_v19  ;;  %v1266_v19 = vmul.f32 %v2717_v53, %v2717_v53 }
 0x5c5   : > { %v1181_v5 = vadd.f32 %v1179_v49, %v1177_v9 }
 0x5c8   : > { %v1106_v22 = vpop.permute.xlu2 %1105  ;;  %v1128_v24 = vpop.xlane.xlu0 %1127 }
 0x5c9   : > { %v1130_v16 = vmul.f32 %v1128_v24, %v2909_v30  ;;  %v1112_v39 = vsel %vm330_vm0, %v1106_v22, 0.0  ;;  %v1226_v22 = vadd.f32 %v1224_v35, %v1222_v20  ;;  %v3625_v35 = vld [vmem:[#allocation19_spill] sm:$0xff] }
 0x5ca   : > { %1113 = vadd.xlane.f32.xlu1 %v1112_v39  ;;  %v1298_v20 = vsel %vm330_vm0, %v3625_v35, 0.0 }
 0x5cb   : > { %v1623_v3 = vsel %vm1581_vm14, %v1621_v12, %v1130_v16  ;;  %v1204_v12 = vsub.f32 %v1200_v42, %v1202_v60 }
 0x5d0   : > { %v3180_v8 = vpop.xlane.xlu0 %1141 }
 0x5d2   : > { %1138 = vadd.xlane.f32.xlu1 %v1137_v4 }
 0x5eb   : > { %1147 = vrot.lane.b32.xlu1 %v2739_v7, %s2298_s18 }
 0x5f3   : > { %1165 = vrot.lane.b32.xlu1 %v1136_v1, %s2298_s18  ;;  %v1150_v1 = vpop.permute.xlu0 %1149 }
 0x5f4   : > { %v1156_v50 = vsel %vm330_vm0, %v1150_v1, 0.0 }
 0x5fb   : > { %1185 = vrot.lane.b32.xlu1 %v1181_v5, %s2298_s18  ;;  %v1164_v10 = vpop.permute.xlu0 %1163 }
 0x5fc   : > { %v1169_v62 = vsel %vm330_vm0, %v1164_v10, 0.0 }
 0x601   : > { %v1125_v54 = vpop.xlane.xlu2 %1124 }
 0x602   : > { %v1129_v43 = vmul.f32 %v1125_v54, %v2909_v30 }
 0x604   : > { %v1622_v21 = vsel %vm1581_vm14, %v1620_v56, %v1129_v43 }
 0x63d   : > { %v3176_v25 = vpop.xlane.xlu1 %1113 }
 0x645   : > { %v3178_v37 = vpop.xlane.xlu1 %1138 }
 0x65d   : > { %v1148_v29 = vpop.permute.xlu1 %1147 }
 0x65e   : > { %v1153_v7 = vsel %vm330_vm0, %v1148_v29, 0.0 }
 0x65f   : > { %1154 = vadd.xlane.f32.xlu2 %v1153_v7 }
 0x665   : > { %v1166_v52 = vpop.permute.xlu1 %1165 }
 0x666   : > { %v1172_v38 = vsel %vm330_vm0, %v1166_v52, 0.0 }
 0x667   : > { %1173 = vadd.xlane.f32.xlu0 %v1172_v38  ;;  %1157 = vadd.xlane.f32.xlu2 %v1156_v50 }
 0x66d   : > { %v1186_v27 = vpop.permute.xlu1 %1185 }
 0x66e   : > { %v1191_v48 = vsel %vm330_vm0, %v1186_v27, 0.0 }
 0x66f   : > { %1192 = vadd.xlane.f32.xlu1 %v1191_v48  ;;  %1170 = vadd.xlane.f32.xlu2 %v1169_v62  ;;  %v1244_v48 = vmul.f32 %v2714_v51, %v2708_v41  ;;  %v1278_v41 = vmul.f32 %v2717_v53, %v2710_v44 }
 0x671   : > { %v1246_v62 = vsub.f32 %v1244_v48, %v1244_v48  ;;  %v1280_v51 = vsub.f32 %v1278_v41, %v1278_v41  ;;  %v1277_v48 = vmul.f32 %v2705_v34, %v2702_v31 }
 0x67b   : > { %1207 = vrot.lane.b32.xlu0 %v3623_v15, %s2298_s18  ;;  %v3624_v15 = vld [vmem:[#allocation13_spill] sm:$0xff] }
 0x687   : > { %1187 = vrot.lane.b32.xlu2 %v1182_v2, %s2298_s18 }
 0x688   : > { %1209 = vrot.lane.b32.xlu1 %v1204_v12, %s2298_s18  ;;  %v1284_v12 = vsel %vm330_vm0, %v1280_v51, 0.0 }
 0x690   : > { %1231 = vrot.lane.b32.xlu1 %v1226_v22, %s2298_s18  ;;  %v3626_v22 = vld [vmem:[#allocation20_spill] sm:$0xff] }
 0x691   : > { %v1312_v54 = vsel %vm330_vm0, %v3626_v22, 0.0 }
 0x6d2   : > { %v1155_v24 = vpop.xlane.xlu2 %1154 }
 0x6d3   : > { %v1159_v63 = vmul.f32 %v1155_v24, %v2909_v30 }
 0x6d5   : > { %v1624_v16 = vsel %vm1584_vm15, %v1622_v21, %v1159_v63 }
 0x6da   : > { %v1158_v39 = vpop.xlane.xlu2 %1157  ;;  %v1174_v7 = vpop.xlane.xlu0 %1173 }
 0x6db   : > { %v1160_v4 = vmul.f32 %v1158_v39, %v2909_v30 }
 0x6dd   : > { %v1625_v49 = vsel %vm1584_vm15, %v1623_v3, %v1160_v4  ;;  %v1245_v3 = vsub.f32 %v2661_v57, %v2661_v57  ;;  %v1264_v57 = vmul.f32 %v2710_v44, %v2710_v44  ;;  %v1176_v4 = vmul.f32 %v1174_v7, %v2909_v30 }
 0x6de   : > { %v1265_v7 = vmul.f32 %v2705_v34, %v2705_v34 }
 0x6df   : > { %v1268_v42 = vadd.f32 %v1266_v19, %v1264_v57  ;;  %v3628_v19 = vld [vmem:[#allocation16_spill] sm:$0xff] }
 0x6e0   : > { %v1309_v57 = vsel %vm330_vm0, %v3628_v19, 0.0 }
 0x6e1   : > { %v1272_v2 = vsel %vm330_vm0, %v1268_v42, 0.0 }
 0x6e2   : > { %v1193_v9 = vpop.xlane.xlu1 %1192  ;;  %v1171_v5 = vpop.xlane.xlu2 %1170 }
 0x6e3   : > { %v1197_v29 = vmul.f32 %v1193_v9, %v2909_v30  ;;  %v1175_v44 = vmul.f32 %v1171_v5, %v2909_v30 }
 0x6e5   : > { %v3214_v1 = vsel %vm1587_vm1, %v1624_v16, %v1197_v29 }
 0x6ea   : > { %v1188_v52 = vpop.permute.xlu2 %1187 }
 0x6eb   : > { %v1194_v38 = vsel %vm330_vm0, %v1188_v52, 0.0 }
 0x6ec   : > { %1195 = vadd.xlane.f32.xlu2 %v1194_v38 }
 0x6ed   : > { %v1208_v56 = vpop.permute.xlu0 %1207 }
 0x6ee   : > { %v1213_v50 = vsel %vm330_vm0, %v1208_v56, 0.0 }
 0x6ef   : > { %1214 = vadd.xlane.f32.xlu0 %v1213_v50 }
 0x6fa   : > { %v1210_v10 = vpop.permute.xlu1 %1209 }
 0x6fb   : > { %v1216_v27 = vsel %vm330_vm0, %v1210_v10, 0.0  ;;  %v1263_v10 = vmul.f32 %v2702_v31, %v2702_v31 }
 0x6fc   : > { %1217 = vadd.xlane.f32.xlu2 %v1216_v27 }
 0x6fd   : > { %v1267_v27 = vadd.f32 %v1265_v7, %v1263_v10 }
 0x702   : > { %v1232_v40 = vpop.permute.xlu1 %1231 }
 0x703   : > { %1249 = vrot.lane.b32.xlu0 %v1245_v3, %s2298_s18  ;;  %v1238_v60 = vsel %vm330_vm0, %v1232_v40, 0.0  ;;  %v1269_v3 = vsel %vm330_vm0, %v1267_v27, 0.0  ;;  %v3627_v40 = vld [vmem:[#allocation15_spill] sm:$0xff] }
 0x70b   : > { %1251 = vrot.lane.b32.xlu0 %v1246_v62, %s2298_s18  ;;  %v1279_v62 = vsub.f32 %v1277_v48, %v1277_v48 }
 0x714   : > { %1229 = vrot.lane.b32.xlu2 %v3624_v15, %s2298_s18  ;;  %v1281_v15 = vsel %vm330_vm0, %v1279_v62, 0.0 }
 0x73d   : > { %1239 = vadd.xlane.f32.xlu2 %v1238_v60  ;;  %v1295_v60 = vsel %vm330_vm0, %v3627_v40, 0.0 }
 0x745   : > { %1273 = vadd.xlane.f32.xlu2 %v1272_v2 }
 0x74d   : > { %1285 = vadd.xlane.f32.xlu2 %v1284_v12 }
 0x755   : > { %1299 = vadd.xlane.f32.xlu2 %v1298_v20 }
 0x75d   : > { %1313 = vadd.xlane.f32.xlu2 %v1312_v54 }
 0x75f   : > { %v1196_v43 = vpop.xlane.xlu2 %1195 }
 0x760   : > { %v1198_v24 = vmul.f32 %v1196_v43, %v2909_v30 }
 0x762   : > { %v1627_v63 = vsel %vm1587_vm1, %v1625_v49, %v1198_v24  ;;  %v1215_v21 = vpop.xlane.xlu0 %1214 }
 0x763   : > { %v1219_v53 = vmul.f32 %v1215_v21, %v2909_v30 }
 0x765   : > { %v1674_v16 = vsel %vm1569_vm10, %v1175_v44, %v1219_v53 }
 0x76f   : > { %v1218_v39 = vpop.xlane.xlu2 %1217 }
 0x770   : > { %v1220_v9 = vmul.f32 %v1218_v39, %v2909_v30 }
 0x772   : > { %v1675_v29 = vsel %vm1569_vm10, %v1176_v4, %v1220_v9 }
 0x775   : > { %1321 = vrot.lane.b32.xlu2 %v1268_v42, %s2298_s18  ;;  %v1250_v52 = vpop.permute.xlu0 %1249 }
 0x776   : > { %v1255_v50 = vsel %vm330_vm0, %v1250_v52, 0.0 }
 0x777   : > { %v1230_v38 = vpop.permute.xlu2 %1229 }
 0x778   : > { %v1235_v49 = vsel %vm330_vm0, %v1230_v38, 0.0 }
 0x779   : > { %1236 = vadd.xlane.f32.xlu1 %v1235_v49 }
 0x77d   : > { %v1252_v56 = vpop.permute.xlu0 %1251 }
 0x77e   : > { %v1258_v5 = vsel %vm330_vm0, %v1252_v56, 0.0 }
 0x77f   : > { %1259 = vadd.xlane.f32.xlu0 %v1258_v5 }
 0x781   : > { %1256 = vadd.xlane.f32.xlu1 %v1255_v50 }
 0x789   : > { %1270 = vadd.xlane.f32.xlu1 %v1269_v3 }
 0x791   : > { %1282 = vadd.xlane.f32.xlu1 %v1281_v15 }
 0x799   : > { %1296 = vadd.xlane.f32.xlu1 %v1295_v60 }
 0x7a1   : > { %1310 = vadd.xlane.f32.xlu1 %v1309_v57 }
 0x7b0   : > { %v1240_v42 = vpop.xlane.xlu2 %1239 }
 0x7b1   : > { %v1242_v2 = vmul.f32 %v1240_v42, %v2909_v30 }
 0x7b3   : > { %v1629_v41 = vsel %vm1590_vm2, %v1627_v63, %v1242_v2 }
 0x7b8   : > { %v1274_v12 = vpop.xlane.xlu2 %1273 }
 0x7b9   : > { %v1276_v31 = vmul.f32 %v1274_v12, %v2909_v30 }
 0x7ba   : > { %1319 = vrot.lane.b32.xlu1 %v1267_v27, %s2298_s18 }
 0x7bb   : > { %v1631_v34 = vsel %vm1593_vm3, %v1629_v41, %v1276_v31 }
 0x7c0   : > { %v1286_v20 = vpop.xlane.xlu2 %1285 }
 0x7c1   : > { %v1288_v9 = vmul.f32 %v1286_v20, %v2909_v30 }
 0x7c2   : > { %1337 = vrot.lane.b32.xlu1 %v1280_v51, %s2298_s18 }
 0x7c8   : > { %v1300_v54 = vpop.xlane.xlu2 %1299 }
 0x7c9   : > { %v1302_v43 = vmul.f32 %v1300_v54, %v2909_v30 }
 0x7cb   : > { %v1633_v24 = vsel %vm1596_vm4, %v1631_v34, %v1302_v43 }
 0x7d0   : > { %v1314_v53 = vpop.xlane.xlu2 %1313 }
 0x7d1   : > { %v1316_v51 = vmul.f32 %v1314_v53, %v2909_v30 }
 0x7d8   : > { %v1322_v12 = vpop.permute.xlu2 %1321 }
 0x7d9   : > { %v1328_v20 = vsel %vm330_vm0, %v1322_v12, 0.0  ;;  %v3633_v12 = vld [vmem:[#allocation35_spill] sm:$0xff] }
 0x7ec   : > { %v1237_v21 = vpop.xlane.xlu1 %1236 }
 0x7ed   : > { %v1241_v44 = vmul.f32 %v1237_v21, %v2909_v30 }
 0x7ef   : > { %v1628_v63 = vsel %vm1590_vm2, %v3214_v1, %v1241_v44 }
 0x7f2   : > { %v1260_v39 = vpop.xlane.xlu0 %1259 }
 0x7f3   : > { %v1262_v4 = vmul.f32 %v1260_v39, %v2909_v30 }
 0x7f4   : > { %v1257_v52 = vpop.xlane.xlu1 %1256 }
 0x7f5   : > { %v1677_v38 = vsel %vm1572_vm11, %v1675_v29, %v1262_v4  ;;  %v1261_v49 = vmul.f32 %v1257_v52, %v2909_v30 }
 0x7f6   : > { %v1679_v56 = vsel %vm1575_vm12, %v1677_v38, %v1288_v9 }
 0x7f7   : > { %v1676_v5 = vsel %vm1572_vm11, %v1674_v16, %v1261_v49  ;;  %v1681_v50 = vsel %vm1578_vm13, %v1679_v56, %v1316_v51  ;;  %v3629_v56 = vld [vmem:[#allocation24_spill] sm:$0xff] }
 0x7fc   : > { %v1271_v1 = vpop.xlane.xlu1 %1270 }
 0x7fd   : > { %v1275_v7 = vmul.f32 %v1271_v1, %v2909_v30 }
 0x7ff   : > { %v1630_v10 = vsel %vm1593_vm3, %v1628_v63, %v1275_v7 }
 0x804   : > { %v1283_v27 = vpop.xlane.xlu1 %1282 }
 0x805   : > { %v1287_v3 = vmul.f32 %v1283_v27, %v2909_v30 }
 0x807   : > { %v1678_v48 = vsel %vm1575_vm12, %v1676_v5, %v1287_v3  ;;  %v3630_v5 = vld [vmem:[#allocation25_spill] sm:$0xff] }
 0x80c   : > { %v1297_v15 = vpop.xlane.xlu1 %1296 }
 0x80d   : > { %v1301_v29 = vmul.f32 %v1297_v15, %v2909_v30 }
 0x80f   : > { %v1632_v60 = vsel %vm1596_vm4, %v1630_v10, %v1301_v29 }
 0x814   : > { %v1311_v57 = vpop.xlane.xlu1 %1310 }
 0x815   : > { %v1315_v16 = vmul.f32 %v1311_v57, %v2909_v30 }
 0x817   : > { %v1680_v42 = vsel %vm1578_vm13, %v1678_v48, %v1315_v16 }
 0x82c   : > { %v1320_v2 = vpop.permute.xlu1 %1319 }
 0x82d   : > { %v1325_v41 = vsel %vm330_vm0, %v1320_v2, 0.0 }
 0x82e   : > { %1326 = vadd.xlane.f32.xlu0 %v1325_v41 }
 0x834   : > { %v1338_v31 = vpop.permute.xlu1 %1337 }
 0x835   : > { %v1344_v34 = vsel %vm330_vm0, %v1338_v31, 0.0  ;;  %v3634_v31 = vld [vmem:[#allocation22_spill] sm:$0xff] }
 0x836   : > { %1345 = vadd.xlane.f32.xlu1 %v1344_v34  ;;  %1329 = vadd.xlane.f32.xlu0 %v1328_v20  ;;  %v3635_v34 = vld [vmem:[#allocation32_spill] sm:$0xff]  ;;  %v3636_v20 = vld [vmem:[#allocation33_spill] sm:$0xff] }
 0x84a   : > { %1335 = vrot.lane.b32.xlu0 %v1279_v62, %s2298_s18 }
 0x84f   : > { %1367 = vrot.lane.b32.xlu1 %v3628_v19, %s2298_s18 }
 0x852   : > { %1351 = vrot.lane.b32.xlu0 %v3627_v40, %s2298_s18 }
 0x85a   : > { %1353 = vrot.lane.b32.xlu0 %v3625_v35, %s2298_s18 }
 0x8a1   : > { %v1327_v54 = vpop.xlane.xlu0 %1326 }
 0x8a2   : > { %v1331_v43 = vmul.f32 %v1327_v54, %v2909_v30  ;;  %v3637_v54 = vsub.f32 %v3635_v34, %v3636_v20 }
 0x8a4   : > { %v1634_v21 = vsel %vm1599_vm5, %v1632_v60, %v1331_v43  ;;  %v3638_v43 = vld [vmem:[#allocation21_spill] sm:$0xff] }
 0x8a9   : > { %v1346_v44 = vpop.xlane.xlu1 %1345  ;;  %v1330_v63 = vpop.xlane.xlu0 %1329 }
 0x8aa   : > { %v1348_v53 = vmul.f32 %v1346_v44, %v2909_v30  ;;  %v1332_v62 = vmul.f32 %v1330_v63, %v2909_v30  ;;  %v1442_v44 = vsub.f32 %v3638_v43, %v3638_v43  ;;  %v3639_v63 = vld [vmem:[#allocation18_spill] sm:$0xff] }
 0x8ac   : > { %v1683_v39 = vsel %vm1581_vm14, %v1681_v50, %v1348_v53  ;;  %v1635_v19 = vsel %vm1599_vm5, %v1633_v24, %v1332_v62  ;;  %v3631_v24 = vsub.f32 %v3629_v56, %v3630_v5  ;;  %v3632_v50 = vld [vmem:[#allocation26_spill] sm:$0xff]  ;;  %v1431_v53 = vsel %vm330_vm0, %v3639_v63, 0.0 }
 0x8bc   : > { %v1336_v4 = vpop.permute.xlu0 %1335 }
 0x8bd   : > { %v1341_v40 = vsel %vm330_vm0, %v1336_v4, 0.0 }
 0x8be   : > { %1342 = vadd.xlane.f32.xlu2 %v1341_v40 }
 0x8c1   : > { %v1368_v35 = vpop.permute.xlu1 %1367 }
 0x8c2   : > { %v1373_v9 = vsel %vm330_vm0, %v1368_v35, 0.0 }
 0x8c3   : > { %1374 = vadd.xlane.f32.xlu1 %v1373_v9 }
 0x8c4   : > { %v1352_v52 = vpop.permute.xlu0 %1351 }
 0x8c5   : > { %v1357_v51 = vsel %vm330_vm0, %v1352_v52, 0.0 }
 0x8c6   : > { %1358 = vadd.xlane.f32.xlu0 %v1357_v51 }
 0x8cc   : > { %v1354_v38 = vpop.permute.xlu0 %1353 }
 0x8cd   : > { %v1360_v49 = vsel %vm330_vm0, %v1354_v38, 0.0 }
 0x8ce   : > { %1361 = vadd.xlane.f32.xlu2 %v1360_v49 }
 0x8dc   : > { %1411 = vrot.lane.b32.xlu1 %v3631_v24, %s2298_s18 }
 0x8e6   : > { %1369 = vrot.lane.b32.xlu2 %v3626_v22, %s2298_s18 }
 0x8ee   : > { %1389 = vrot.lane.b32.xlu2 %v3632_v50, %s2298_s18 }
 0x931   : > { %v1343_v1 = vpop.xlane.xlu2 %1342 }
 0x932   : > { %v1347_v7 = vmul.f32 %v1343_v1, %v2909_v30 }
 0x934   : > { %v1682_v10 = vsel %vm1581_vm14, %v1680_v42, %v1347_v7  ;;  %v1434_v7 = vsel %vm330_vm0, %v3634_v31, 0.0 }
 0x936   : > { %v1375_v27 = vpop.xlane.xlu1 %1374 }
 0x937   : > { %v1379_v3 = vmul.f32 %v1375_v27, %v2909_v30 }
 0x939   : > { %v1684_v48 = vsel %vm1584_vm15, %v1682_v10, %v1379_v3  ;;  %v1359_v62 = vpop.xlane.xlu0 %1358  ;;  %v3640_v10 = vld [vmem:[#allocation17_spill] sm:$0xff] }
 0x93a   : > { %v1363_v9 = vmul.f32 %v1359_v62, %v2909_v30  ;;  %v1441_v27 = vsub.f32 %v3640_v10, %v3640_v10 }
 0x93c   : > { %v1636_v56 = vsel %vm1602_vm6, %v1634_v21, %v1363_v9  ;;  %v1443_v3 = vsel %vm330_vm0, %v1441_v27, 0.0  ;;  %v1446_v21 = vsel %vm330_vm0, %v1442_v44, 0.0 }
 0x941   : > { %v1362_v15 = vpop.xlane.xlu2 %1361 }
 0x942   : > { %v1364_v29 = vmul.f32 %v1362_v15, %v2909_v30 }
 0x944   : > { %v1637_v60 = vsel %vm1602_vm6, %v1635_v19, %v1364_v29  ;;  %v3641_v29 = vld [vmem:[#allocation36_spill] sm:$0xff] }
 0x949   : > { %v1370_v57 = vpop.permute.xlu2 %1369 }
 0x94a   : > { %v1376_v22 = vsel %vm330_vm0, %v1370_v57, 0.0 }
 0x94b   : > { %1377 = vadd.xlane.f32.xlu0 %v1376_v22 }
 0x94e   : > { %v1412_v16 = vpop.permute.xlu1 %1411 }
 0x94f   : > { %v1417_v2 = vsel %vm330_vm0, %v1412_v16, 0.0 }
 0x950   : > { %1418 = vadd.xlane.f32.xlu1 %v1417_v2  ;;  %v3642_v2 = vld [vmem:[#allocation34_spill] sm:$0xff] }
 0x951   : > { %v1390_v41 = vpop.permute.xlu2 %1389 }
 0x952   : > { %v1395_v42 = vsel %vm330_vm0, %v1390_v41, 0.0  ;;  %v1552_v41 = vsub.f32 %v3642_v2, %v3642_v2 }
 0x953   : > { %1396 = vadd.xlane.f32.xlu2 %v1395_v42 }
 0x95f   : > { %1391 = vrot.lane.b32.xlu0 %v3633_v12, %s2298_s18 }
 0x969   : > { %1455 = vrot.lane.b32.xlu1 %v3634_v31, %s2298_s18 }
 0x96b   : > { %1413 = vrot.lane.b32.xlu2 %v3637_v54, %s2298_s18 }
 0x971   : > { %1471 = vrot.lane.b32.xlu1 %v1442_v44, %s2298_s18 }
 0x994   : > { %1432 = vadd.xlane.f32.xlu2 %v1431_v53 }
 0x9be   : > { %v1378_v19 = vpop.xlane.xlu0 %1377 }
 0x9bf   : > { %v1380_v4 = vmul.f32 %v1378_v19, %v2909_v30 }
 0x9c1   : > { %v1685_v40 = vsel %vm1584_vm15, %v1683_v39, %v1380_v4 }
 0x9c3   : > { %v1419_v35 = vpop.xlane.xlu1 %1418 }
 0x9c4   : > { %v1423_v52 = vmul.f32 %v1419_v35, %v2909_v30  ;;  %v3644_v35 = vld [vmem:[#allocation37_spill] sm:$0xff] }
 0x9c6   : > { %v1686_v51 = vsel %vm1587_vm1, %v1684_v48, %v1423_v52  ;;  %v1397_v38 = vpop.xlane.xlu2 %1396 }
 0x9c7   : > { %v1401_v49 = vmul.f32 %v1397_v38, %v2909_v30  ;;  %v3645_v38 = vld [vmem:[#allocation31_spill] sm:$0xff] }
 0x9c9   : > { %v1638_v5 = vsel %vm1605_vm7, %v1636_v56, %v1401_v49  ;;  %v3646_v49 = vld [vmem:[#allocation23_spill] sm:$0xff] }
 0x9ca   : > { %v3647_v56 = vld [vmem:[#allocation27_spill] sm:$0xff] }
 0x9ce   : > { %v1414_v1 = vpop.permute.xlu2 %1413 }
 0x9cf   : > { %v1420_v39 = vsel %vm330_vm0, %v1414_v1, 0.0  ;;  %v3650_v1 = vld [vmem:[#allocation38_spill] sm:$0xff] }
 0x9d1   : > { %v1392_v24 = vpop.permute.xlu0 %1391 }
 0x9d2   : > { %v1398_v50 = vsel %vm330_vm0, %v1392_v24, 0.0  ;;  %v3648_v24 = vsub.f32 %v3646_v49, %v3647_v56 }
 0x9d3   : > { %1399 = vadd.xlane.f32.xlu0 %v1398_v50  ;;  %v3649_v50 = vld [vmem:[#allocation28_spill] sm:$0xff] }
 0x9db   : > { %1421 = vadd.xlane.f32.xlu0 %v1420_v39  ;;  %v1456_v48 = vpop.permute.xlu1 %1455  ;;  %v3651_v39 = vsub.f32 %v3649_v50, %v3650_v1 }
 0x9dc   : > { %v1462_v15 = vsel %vm330_vm0, %v1456_v48, 0.0 }
 0x9e3   : > { %1435 = vadd.xlane.f32.xlu0 %v1434_v7  ;;  %v1472_v7 = vpop.permute.xlu1 %1471 }
 0x9e4   : > { %v1478_v10 = vsel %vm330_vm0, %v1472_v7, 0.0 }
 0x9eb   : > { %1444 = vadd.xlane.f32.xlu0 %v1443_v3 }
 0x9f3   : > { %1447 = vadd.xlane.f32.xlu0 %v1446_v21 }
 0xa07   : > { %1453 = vrot.lane.b32.xlu0 %v3639_v63, %s2298_s18 }
 0xa31   : > { %1463 = vadd.xlane.f32.xlu0 %v1462_v15 }
 0xa45   : > { %1537 = vrot.lane.b32.xlu0 %v3641_v29, %s2298_s18 }
 0xa46   : > { %v1400_v57 = vpop.xlane.xlu0 %1399 }
 0xa47   : > { %v1402_v22 = vmul.f32 %v1400_v57, %v2909_v30 }
 0xa49   : > { %v1639_v16 = vsel %vm1605_vm7, %v1637_v60, %v1402_v22 }
 0xa4d   : > { %1557 = vrot.lane.b32.xlu0 %v1552_v41, %s2298_s18 }
 0xa4e   : > { %v1422_v42 = vpop.xlane.xlu0 %1421 }
 0xa4f   : > { %v1424_v12 = vmul.f32 %v1422_v42, %v2909_v30 }
 0xa51   : > { %v1687_v31 = vsel %vm1587_vm1, %v1685_v40, %v1424_v12  ;;  %v3643_v40 = vld [vmem:[#allocation29_spill] sm:$0xff] }
 0xa56   : > { %v1436_v34 = vpop.xlane.xlu0 %1435 }
 0xa57   : > { %v1438_v20 = vmul.f32 %v1436_v34, %v2909_v30 }
 0xa59   : > { %v1641_v54 = vsel %vm1608_vm8, %v1639_v16, %v1438_v20  ;;  %v3652_v20 = vld [vmem:[#allocation30_spill] sm:$0xff] }
 0xa5e   : > { %v1445_v43 = vpop.xlane.xlu0 %1444 }
 0xa5f   : > { %v1449_v44 = vmul.f32 %v1445_v43, %v2909_v30 }
 0xa61   : > { %v1688_v60 = vsel %vm1590_vm2, %v1686_v51, %v1449_v44 }
 0xa66   : > { %v1448_v63 = vpop.xlane.xlu0 %1447 }
 0xa67   : > { %v1450_v53 = vmul.f32 %v1448_v63, %v2909_v30 }
 0xa69   : > { %v3375_v62 = vsel %vm1590_vm2, %v1687_v31, %v1450_v53 }
 0xa79   : > { %v1454_v19 = vpop.permute.xlu0 %1453 }
 0xa7a   : > { %v1459_v4 = vsel %vm330_vm0, %v1454_v19, 0.0 }
 0xa7b   : > { %1460 = vadd.xlane.f32.xlu2 %v1459_v4 }
 0xa93   : > { %1469 = vrot.lane.b32.xlu2 %v1441_v27, %s2298_s18  ;;  %v1433_v27 = vpop.xlane.xlu2 %1432 }
 0xa94   : > { %v1437_v3 = vmul.f32 %v1433_v27, %v2909_v30  ;;  %v3654_v27 = vld [vmem:[#allocation14_spill] sm:$0xff] }
 0xa96   : > { %v1640_v15 = vsel %vm1608_vm8, %v1638_v5, %v1437_v3  ;;  %v1551_v5 = vsub.f32 %v3652_v20, %v3652_v20  ;;  %v807_v3 = vmul.f32 %v3654_v27, %v2909_v30  ;;  %v979_v20 = vmul.f32 %v3053_v45, %v2909_v30 }
 0xa97   : > { %v1115_v45 = vmul.f32 %v3160_v23, %v2909_v30 }
 0xa9b   : > { %1491 = vrot.lane.b32.xlu2 %v3643_v40, %s2298_s18 }
 0xaa3   : > { %1493 = vrot.lane.b32.xlu2 %v3644_v35, %s2298_s18 }
 0xaa4   : > { %v1464_v9 = vpop.xlane.xlu0 %1463 }
 0xaa5   : > { %v1466_v52 = vmul.f32 %v1464_v9, %v2909_v30 }
 0xaa7   : > { %v3385_v51 = vsel %vm1611_vm9, %v1641_v54, %v1466_v52 }
 0xaab   : > { %1535 = vrot.lane.b32.xlu2 %v3645_v38, %s2298_s18 }
 0xab3   : > { %1513 = vrot.lane.b32.xlu2 %v3648_v24, %s2298_s18 }
 0xab7   : > { %v1538_v41 = vpop.permute.xlu0 %1537 }
 0xab8   : > { %v1544_v12 = vsel %vm330_vm0, %v1538_v41, 0.0  ;;  %v931_v41 = vmul.f32 %v3075_v6, %v2909_v30  ;;  %v1055_v6 = vmul.f32 %v3125_v17, %v2909_v30 }
 0xabb   : > { %1515 = vrot.lane.b32.xlu2 %v3651_v39, %s2298_s18  ;;  %v3653_v39 = vld [vmem:[#allocation12_spill] sm:$0xff] }
 0xabc   : > { %v735_v7 = vmul.f32 %v3653_v39, %v2909_v30  ;;  %v3658_v39 = vld [vmem:[#allocation42_spill] sm:$0xff] }
 0xabf   : > { %v1558_v53 = vpop.permute.xlu0 %1557 }
 0xac0   : > { %v1564_v19 = vsel %vm330_vm0, %v1558_v53, 0.0 }
 0xae4   : > { %1479 = vadd.xlane.f32.xlu2 %v1478_v10  ;;  %v779_v10 = vmul.f32 %v2905_v14, %v2909_v30  ;;  %v899_v14 = vmul.f32 %v3072_v18, %v2909_v30  ;;  %v1011_v18 = vmul.f32 %v3099_v58, %v2909_v30  ;;  %v1143_v58 = vmul.f32 %v3178_v37, %v2909_v30 }
 0xaee   : > { %v1461_v21 = vpop.xlane.xlu2 %1460 }
 0xaef   : > { %v1465_v48 = vmul.f32 %v1461_v21, %v2909_v30 }
 0xaf1   : > { %v1642_v29 = vsel %vm1611_vm9, %v1640_v15, %v1465_v48  ;;  %v3655_v48 = vld [vmem:[#allocation43_spill] sm:$0xff] }
 0xaf2   : > { %v835_v15 = vmul.f32 %v3655_v48, %v2909_v30  ;;  %v868_v48 = vmul.f32 %v2989_v26, %v2909_v30  ;;  %v980_v26 = vmul.f32 %v3079_v33, %v2909_v30  ;;  %v1116_v33 = vmul.f32 %v3176_v25, %v2909_v30 }
 0xaf6   : > { %v1470_v57 = vpop.permute.xlu2 %1469 }
 0xaf7   : > { %v1475_v22 = vsel %vm330_vm0, %v1470_v57, 0.0  ;;  %v3656_v57 = vld [vmem:[#allocation41_spill] sm:$0xff] }
 0xaf8   : > { %1476 = vadd.xlane.f32.xlu1 %v1475_v22  ;;  %v867_v22 = vmul.f32 %v3656_v57, %v2909_v30 }
 0xafe   : > { %v1492_v16 = vpop.permute.xlu2 %1491 }
 0xaff   : > { %v1497_v2 = vsel %vm330_vm0, %v1492_v16, 0.0 }
 0xb00   : > { %1498 = vadd.xlane.f32.xlu0 %v1497_v2 }
 0xb06   : > { %v1494_v42 = vpop.permute.xlu2 %1493 }
 0xb07   : > { %v1500_v4 = vsel %vm330_vm0, %v1494_v42, 0.0 }
 0xb08   : > { %1545 = vadd.xlane.f32.xlu0 %v1544_v12 }
 0xb0e   : > { %v1536_v31 = vpop.permute.xlu2 %1535 }
 0xb0f   : > { %v1541_v34 = vsel %vm330_vm0, %v1536_v31, 0.0  ;;  %v951_v31 = vmul.f32 %v3028_v28, %v2909_v30  ;;  %v1083_v28 = vmul.f32 %v3121_v36, %v2909_v30 }
 0xb10   : > { %1542 = vadd.xlane.f32.xlu2 %v1541_v34 }
 0xb11   : > { %1555 = vrot.lane.b32.xlu1 %v1551_v5, %s2298_s18 }
 0xb16   : > { %v1514_v54 = vpop.permute.xlu2 %1513 }
 0xb17   : > { %v1519_v43 = vsel %vm330_vm0, %v1514_v54, 0.0 }
 0xb18   : > { %1520 = vadd.xlane.f32.xlu2 %v1519_v43 }
 0xb1e   : > { %v1516_v44 = vpop.permute.xlu2 %1515 }
 0xb1f   : > { %v1522_v63 = vsel %vm330_vm0, %v1516_v44, 0.0 }
 0xb20   : > { %1523 = vadd.xlane.f32.xlu0 %v1522_v63 }
 0xb28   : > { %1565 = vadd.xlane.f32.xlu0 %v1564_v19 }
 0xb3b   : > { %1501 = vadd.xlane.f32.xlu1 %v1500_v4 }
 0xb54   : > { %1700 = vrot.lane.b32.xlu1 %v1642_v29, %s2300_s23 }
 0xb57   : > { %v1480_v52 = vpop.xlane.xlu2 %1479 }
 0xb58   : > { %v1482_v36 = vmul.f32 %v1480_v52, %v2909_v30 }
 0xb6b   : > { %v1477_v40 = vpop.xlane.xlu1 %1476 }
 0xb6c   : > { %v1481_v35 = vmul.f32 %v1477_v40, %v2909_v30 }
 0xb6e   : > { %v3416_v9 = vsel %vm1593_vm3, %v1688_v60, %v1481_v35  ;;  %v1691_v35 = vsel %vm1593_vm3, %v3375_v62, %v1482_v36  ;;  %v3657_v62 = vld [vmem:[#allocation40_spill] sm:$0xff] }
 0xb73   : > { %v1499_v38 = vpop.xlane.xlu0 %1498 }
 0xb74   : > { %v1503_v24 = vmul.f32 %v1499_v38, %v2909_v30 }
 0xb7b   : > { %v1546_v42 = vpop.xlane.xlu0 %1545 }
 0xb83   : > { %v1556_v49 = vpop.permute.xlu1 %1555  ;;  %v1543_v56 = vpop.xlane.xlu2 %1542 }
 0xb84   : > { %v1561_v50 = vsel %vm330_vm0, %v1556_v49, 0.0  ;;  %v1547_v1 = vmul.f32 %v1543_v56, %v2909_v30  ;;  %vm1722_vm0 = vcmask 130048  }
 0xb85   : > { %1562 = vadd.xlane.f32.xlu2 %v1561_v50 }
 0xb86   : > { %v1644_v60 = vsel %vm1569_vm10, %v1503_v24, %v1547_v1  ;;  %v1548_v24 = vmul.f32 %v1546_v42, %v2909_v30  ;;  %v736_v1 = vmul.f32 %v3657_v62, %v2909_v30 }
 0xb87   : > { %v1646_v21 = vsel %vm1572_vm11, %v1644_v60, %v735_v7  ;;  %v780_v7 = vmul.f32 %v3658_v39, %v2909_v30 }
 0xb88   : > { %v1648_v29 = vsel %vm1575_vm12, %v1646_v21, %v779_v10  ;;  %v3659_v10 = vld [vmem:[#allocation39_spill] sm:$0xff] }
 0xb89   : > { %v1650_v16 = vsel %vm1578_vm13, %v1648_v29, %v807_v3  ;;  %v808_v60 = vmul.f32 %v3659_v10, %v2909_v30  ;;  %v836_v3 = vmul.f32 %v2924_v59, %v2909_v30  ;;  %v900_v29 = vmul.f32 %v3049_v46, %v2909_v30 }
 0xb8a   : > { %v1652_v2 = vsel %vm1581_vm14, %v1650_v16, %v835_v15  ;;  %v952_v59 = vmul.f32 %v3051_v11, %v2909_v30  ;;  %v1012_v46 = vmul.f32 %v3064_v55, %v2909_v30  ;;  %v1084_v11 = vmul.f32 %v3123_v32, %v2909_v30 }
 0xb8b   : > { %v1654_v12 = vsel %vm1584_vm15, %v1652_v2, %v867_v22  ;;  %v932_v22 = vmul.f32 %v3038_v0, %v2909_v30  ;;  %v1056_v0 = vmul.f32 %v3117_v61, %v2909_v30  ;;  %v1144_v55 = vmul.f32 %v3180_v8, %v2909_v30  ;;  %v1521_v32 = vpop.xlane.xlu2 %1520 }
 0xb8c   : > { %v1656_v34 = vsel %vm1587_vm1, %v1654_v12, %v899_v14 }
 0xb8d   : > { %v1658_v5 = vsel %vm1590_vm2, %v1656_v34, %v931_v41 }
 0xb8e   : > { %v1660_v54 = vsel %vm1593_vm3, %v1658_v5, %v951_v31  ;;  %v1525_v5 = vmul.f32 %v1521_v32, %v2909_v30 }
 0xb8f   : > { %v1662_v43 = vsel %vm1596_vm4, %v1660_v54, %v979_v20 }
 0xb90   : > { %v1664_v44 = vsel %vm1599_vm5, %v1662_v43, %v1011_v18  ;;  %v1692_v54 = vsel %vm1596_vm4, %v3416_v9, %v1525_v5 }
 0xb91   : > { %v1666_v63 = vsel %vm1602_vm6, %v1664_v44, %v1055_v6 }
 0xb92   : > { %v1668_v53 = vsel %vm1605_vm7, %v1666_v63, %v1083_v28 }
 0xb93   : > { %v1524_v19 = vpop.xlane.xlu0 %1523  ;;  %v1670_v17 = vsel %vm1608_vm8, %v1668_v53, %v1115_v45 }
 0xb94   : > { %v1672_v4 = vsel %vm1611_vm9, %v1670_v17, %v1143_v58  ;;  %v1526_v40 = vmul.f32 %v1524_v19, %v2909_v30 }
 0xb95   : > { %1708 = vrot.lane.b32.xlu0 %v1672_v4, %s2301_s26 }
 0xb96   : > { %v1693_v38 = vsel %vm1596_vm4, %v1691_v35, %v1526_v40 }
 0xb9b   : > { %v1566_v23 = vpop.xlane.xlu0 %1565 }
 0xb9c   : > { %v1568_v37 = vmul.f32 %v1566_v23, %v2909_v30 }
 0xb9d   : > { %1702 = vrot.lane.b32.xlu2 %v3385_v51, %s2300_s23 }
 0xb9e   : > { %v1695_v49 = vsel %vm1599_vm5, %v1693_v38, %v1568_v37 }
 0xb9f   : > { %v1697_v56 = vsel %vm1602_vm6, %v1695_v49, 0.0 }
 0xba0   : > { %1718 = vrot.lane.b32.xlu0 %v1697_v56, %s2302_s27 }
 0xbae   : > { %v1502_v52 = vpop.xlane.xlu1 %1501 }
 0xbaf   : > { %v1504_v50 = vmul.f32 %v1502_v52, %v2909_v30 }
 0xbb1   : > { %v1645_v51 = vsel %vm1569_vm10, %v1504_v50, %v1548_v24  ;;  %vm1728_vm10 = vcmask 392192  }
 0xbb2   : > { %v1647_v27 = vsel %vm1572_vm11, %v1645_v51, %v736_v1  ;;  %vm1725_vm11 = vcmask 261120  }
 0xbb3   : > { %v1649_v21 = vsel %vm1575_vm12, %v1647_v27, %v780_v7 }
 0xbb4   : > { %v1651_v15 = vsel %vm1578_vm13, %v1649_v21, %v808_v60 }
 0xbb5   : > { %v1653_v57 = vsel %vm1581_vm14, %v1651_v15, %v836_v3 }
 0xbb6   : > { %v1655_v16 = vsel %vm1584_vm15, %v1653_v57, %v868_v48 }
 0xbb7   : > { %v1657_v14 = vsel %vm1587_vm1, %v1655_v16, %v900_v29 }
 0xbb8   : > { %v1659_v2 = vsel %vm1590_vm2, %v1657_v14, %v932_v22 }
 0xbb9   : > { %v1661_v41 = vsel %vm1593_vm3, %v1659_v2, %v952_v59 }
 0xbba   : > { %v1663_v42 = vsel %vm1596_vm4, %v1661_v41, %v980_v26 }
 0xbbb   : > { %v1665_v12 = vsel %vm1599_vm5, %v1663_v42, %v1012_v46 }
 0xbbc   : > { %v1667_v31 = vsel %vm1602_vm6, %v1665_v12, %v1056_v0 }
 0xbbd   : > { %v1669_v34 = vsel %vm1605_vm7, %v1667_v31, %v1084_v11 }
 0xbbe   : > { %v1671_v61 = vsel %vm1608_vm8, %v1669_v34, %v1116_v33 }
 0xbbf   : > { %v1673_v20 = vsel %vm1611_vm9, %v1671_v61, %v1144_v55 }
 0xbc0   : > { %1710 = vrot.lane.b32.xlu1 %v1673_v20, %s2301_s26 }
 0xbc6   : > { %v1701_v43 = vpop.permute.xlu1 %1700 }
 0xbf8   : > { %v1563_v18 = vpop.xlane.xlu2 %1562 }
 0xbf9   : > { %v1567_v25 = vmul.f32 %v1563_v18, %v2909_v30 }
 0xbfb   : > { %v1694_v8 = vsel %vm1599_vm5, %v1692_v54, %v1567_v25 }
 0xbfc   : > { %v1696_v6 = vsel %vm1602_vm6, %v1694_v8, 0.0 }
 0xbfd   : > { %1716 = vrot.lane.b32.xlu2 %v1696_v6, %s2302_s27 }
 0xc00   : > { %v1703_v44 = vpop.permute.xlu2 %1702 }
 0xc01   : > { %v1724_v45 = vsel %vm1722_vm0, %v3047_v13, %v1703_v44  ;;  %v1723_v13 = vsel %vm1722_vm0, %v3016_v47, %v1701_v43 }
 0xc07   : > { %v1709_v28 = vpop.permute.xlu0 %1708 }
 0xc08   : > { %v1726_v53 = vsel %vm1725_vm11, %v1723_v13, %v1709_v28 }
 0xc12   : > { %v1719_v63 = vpop.permute.xlu0 %1718 }
 0xc32   : > { %v1711_v30 = vpop.permute.xlu1 %1710 }
 0xc33   : > { %v1727_v9 = vsel %vm1725_vm11, %v1724_v45, %v1711_v30 }
 0xc34   : > { %v1730_v58 = vsel %vm1728_vm10, %v1727_v9, %v1719_v63 }
 0xc35   : > { %1732 = vst [vmem:[%s223_s29 + $0x8] sm:$0xff] %v1730_v58 }
 0xc57   : > { %v1717_v19 = vpop.permute.xlu2 %1716 }
 0xc58   : > { %v1729_v17 = vsel %vm1728_vm10, %v1726_v53, %v1717_v19 }
 0xc59   : > { %1731 = vst [vmem:[%s223_s29] sm:$0xff] %v1729_v17 }
 0xc5a   : > { %2247 = shalt.err (!%p2244_p10)
}
 0xc5b   : > { %s2303_s22 = smov 128   ;;  %s2304_s26 = smov 8  }
 0xc5c   : > { %2052 = dma.vmem_to_hbm [thread:$0]  (%p2391_p3), %s1747_s17, 256, %s1749_s20, %s1734_s11, %s2303_s22, %s2303_s22, %s2304_s26  }
 0xc5d PF: > { %s1763_s27 = sand.u32 1, %s2278_s12   ;;  %p3660_p12 = scmp.ge.s32.totalorder %s2290_s15, 2 }
 0xc5e   : > { %s1764_s28 = scalar_lea.sflag [#allocation4], %s1763_s27 }
 0xc5f   : > { %p2066_p13 = pnand %p3660_p12, %p2360_p6 }
 0xc61   : > { %p2067_p0 = pneg %p2066_p13 }
 0xc63   : > { %2273 = dma.done.wait (%p2067_p0), %s1764_s28, 256  }
 0xc64   : > { %2275 = vsyncadd (%p2067_p0), %s1764_s28, 4294967040  ;;  %p17_p5 = scmp.ge.s32.totalorder %s2381_s6, 4   ;;  %s3661_s12 = smov %s2282_s13 }
 0xc65   : > { %s3662_s13 = smov %s2286_s14  ;;  %s3663_s14 = smov %s2397_s10 }
 0xc66   : > { %s3664_s15 = smov %s2381_s6  ;;  %19 = sbr.rel (!%p17_p5) target bundleno = 6 (0x6), region = 85 }
 0xc6b   :  { %1770 = vsyncpa [#allocation3], 1 }
 0xc6c   :  { %1772 = vsyncpa [#allocation3 + $0x1], 1 }
 0xc6d   :  { %1773 = vsyncpa [#allocation6], 1 }
 0xc6e   :  { %1774 = vsyncpa [#allocation4], 1 }
 0xc6f   :  { %1776 = vsyncpa [#allocation4 + $0x1], 1 }

</bundles_post_ra>
